<compile_context>
chip_gen: v6e
topology: v6e:2x2x1
jax: 0.10.0
libtpu: 0.0.40
codegen_flags: <defaults>
</compile_context>

<pallas_src>
import functools

import jax
import jax.numpy as jnp
from jax.experimental import pallas as pl
from jax.experimental.pallas import tpu as pltpu


def _round_up(x, m):
    return ((x + m - 1) // m) * m


# --------------------------------------------------------------------------- #
# Per-chip VMEM capacity (never request more than physical; v7x has 64 MiB/TC)
# --------------------------------------------------------------------------- #
_VMEM_CAP_BYTES = None


def _vmem_cap_bytes():
    global _VMEM_CAP_BYTES
    if _VMEM_CAP_BYTES is None:
        try:
            _VMEM_CAP_BYTES = int(pltpu.get_tpu_info().vmem_capacity_bytes)
        except Exception:
            _VMEM_CAP_BYTES = 64 * 1024 * 1024   # min across v5e/v6e/v7x
    return _VMEM_CAP_BYTES


def _vmem_limit(needed_bytes):
    cap = int(0.9 * _vmem_cap_bytes())
    return int(min(cap, max(32 * 1024 * 1024, 2 * int(needed_bytes))))


# --------------------------------------------------------------------------- #
# Kernels
# --------------------------------------------------------------------------- #
def make_gru_kernel(nlayers, batch, batch_p, hpad, nvocab):
    """Embedding gather + L-layer GRU stack for a single time step."""
    L, B, Bp, Hp = nlayers, batch, batch_p, hpad

    def kernel(tok_ref, emb_ref, h_ref, *refs):
        # ref layout (after the 3 fixed inputs):
        #   L fused GRU weights (bf16), L fused biases (f32),
        #   hnew out, h_last out, x_scratch, dma sems
        w_refs = refs[0:L]                       # (in_l_pad + Hp, 4*Hp) bf16
        b_refs = refs[L:2 * L]                   # (1, 4*Hp) f32
        hnew_ref = refs[2 * L]                   # out: (L, Bp, Hp) f32
        hlast_ref = refs[2 * L + 1]              # out: (Bp, Hp) f32
        x_scratch = refs[2 * L + 2]              # scratch: (Bp, in_pad) f32
        sem = refs[2 * L + 3]                    # DMA sems: (B,)

        # Zero only the padded batch rows (disjoint from the DMA target rows,
        # so there is no write-write hazard with the async copies below).
        if B < Bp:
            x_scratch[pl.ds(B, Bp - B), :] = jnp.zeros(
                (Bp - B, x_scratch.shape[1]), x_scratch.dtype)

        # DMA gather: one (1, in_pad) embedding row per *real* batch element.
        copies = []
        for b in range(B):
            tok = jnp.clip(tok_ref[b], 0, nvocab - 1)   # bounds-safe
            cp = pltpu.make_async_copy(
                emb_ref.at[pl.ds(tok, 1), :],
                x_scratch.at[pl.ds(b, 1), :],
                sem.at[b])
            cp.start()
            copies.append(cp)
        for cp in copies:
            cp.wait()

        # dropout(input): eval-mode identity
        x = x_scratch[...]                               # (Bp, in_pad) f32
        for l in range(L):
            h_prev = h_ref[l]                            # (Bp, Hp) f32
            xh = jnp.concatenate([x, h_prev], axis=-1).astype(jnp.bfloat16)
            # single fused MXU push per layer: [ r | z | i_n | h_n ], f32 accum
            g = jnp.dot(xh, w_refs[l][...],
                        preferred_element_type=jnp.float32) + b_refs[l][...]
            r = jax.nn.sigmoid(g[:, 0:Hp])
            z = jax.nn.sigmoid(g[:, Hp:2 * Hp])
            n = jnp.tanh(g[:, 2 * Hp:3 * Hp] + r * g[:, 3 * Hp:4 * Hp])
            h_new = (1.0 - z) * n + z * h_prev
            hnew_ref[l] = h_new
            x = h_new                                    # feed next layer
        hlast_ref[...] = x                               # input to the head call

    return kernel


def head_kernel(h_ref, w_ref, b_ref, o_ref):
    """One lane-dense vocab tile of the output head (bf16 weights, f32 accum)."""
    # dropout(output): eval-mode identity
    o_ref[...] = (jnp.dot(h_ref[...].astype(jnp.bfloat16), w_ref[...],
                          preferred_element_type=jnp.float32)
                  + b_ref[...])


# --------------------------------------------------------------------------- #
# One-time parameter preparation (pad / transpose / fuse / cast -- NOT per call)
# --------------------------------------------------------------------------- #
def prepare_params(params, *, ninput, nhidden, nlayers, nvocab, v_tile=2048):
    H = nhidden
    Hp = _round_up(nhidden, 128)
    in_pad = _round_up(ninput, 128)
    Vp = _round_up(nvocab, 128)
    if Vp <= v_tile:
        tv = Vp
    else:
        tv = v_tile
        Vp = _round_up(nvocab, v_tile)

    # Embedding table stays f32: the gather only moves `batch` rows, so its HBM
    # traffic is negligible and f32 keeps the GRU input exact.
    emb = jnp.zeros((nvocab, in_pad), jnp.float32).at[:, :ninput].set(params["emb"])

    w_fused, b_fused = [], []
    for l in range(nlayers):
        in_l = ninput if l == 0 else nhidden
        in_l_pad = in_pad if l == 0 else Hp
        w_ih = params["w_ih"][l]     # (3H, in_l), gate order r|z|n (PyTorch)
        w_hh = params["w_hh"][l]     # (3H, H)
        b_ih = params["b_ih"][l]
        b_hh = params["b_hh"][l]

        W = jnp.zeros((in_l_pad + Hp, 4 * Hp), jnp.float32)
        # column blocks (128-aligned): [ r | z | i_n | h_n ]
        W = W.at[:in_l, 0:H].set(w_ih[0:H].T)                              # r, x path
        W = W.at[in_l_pad:in_l_pad + H, 0:H].set(w_hh[0:H].T)              # r, h path
        W = W.at[:in_l, Hp:Hp + H].set(w_ih[H:2 * H].T)                    # z, x path
        W = W.at[in_l_pad:in_l_pad + H, Hp:Hp + H].set(w_hh[H:2 * H].T)    # z, h path
        W = W.at[:in_l, 2 * Hp:2 * Hp + H].set(w_ih[2 * H:3 * H].T)        # i_n
        W = W.at[in_l_pad:in_l_pad + H, 3 * Hp:3 * Hp + H].set(w_hh[2 * H:3 * H].T)  # h_n
        w_fused.append(W.astype(jnp.bfloat16))     # bf16 storage, f32 accumulation

        bias = jnp.zeros((1, 4 * Hp), jnp.float32)
        bias = bias.at[0, 0:H].set(b_ih[0:H] + b_hh[0:H])
        bias = bias.at[0, Hp:Hp + H].set(b_ih[H:2 * H] + b_hh[H:2 * H])
        bias = bias.at[0, 2 * Hp:2 * Hp + H].set(b_ih[2 * H:3 * H])
        bias = bias.at[0, 3 * Hp:3 * Hp + H].set(b_hh[2 * H:3 * H])
        b_fused.append(bias)                       # biases stay f32 (tiny)

    w_out_t = (jnp.zeros((Hp, Vp), jnp.float32)
               .at[:H, :nvocab].set(params["w_out"].T)).astype(jnp.bfloat16)
    b_out = jnp.zeros((1, Vp), jnp.float32).at[0, :nvocab].set(params["b_out"])

    prepared = {
        "emb": emb,
        "w_fused": tuple(w_fused),
        "b_fused": tuple(b_fused),
        "w_out_t": w_out_t,
        "b_out": b_out,
    }
    meta = dict(ninput=ninput, nhidden=nhidden, nlayers=nlayers, nvocab=nvocab,
                hpad=Hp, in_pad=in_pad, vpad=Vp, v_tile=tv)
    return prepared, meta


# --------------------------------------------------------------------------- #
# Forward wrapper
# --------------------------------------------------------------------------- #
@functools.partial(jax.jit, static_argnames=(
    "ninput", "nhidden", "nlayers", "nvocab", "hpad", "in_pad", "vpad", "v_tile"))
def event_lm_forward(tokens, hidden, prepared, *, ninput, nhidden, nlayers, nvocab,
                     hpad, in_pad, vpad, v_tile):
    """tokens: (B, 1) int; hidden: (L, B, H) f32. Returns (logits (B, V), hidden)."""
    del ninput  # shapes carried by the prepared params
    batch = tokens.shape[0]
    Bp = max(8, _round_up(batch, 8))
    L, Hp, Vp, TV = nlayers, hpad, vpad, v_tile
    n_vtiles = Vp // TV
    f32b, bf16b = 4, 2

    tok = jnp.zeros((Bp,), jnp.int32).at[:batch].set(tokens[:, 0].astype(jnp.int32))
    h_pad = jnp.zeros((L, Bp, Hp), jnp.float32).at[:, :batch, :nhidden].set(hidden)

    # --------------- call 1: embedding gather + GRU stack (single step) --------
    gru_kernel = make_gru_kernel(L, batch, Bp, Hp, nvocab)

    gru_in_specs = [
        pl.BlockSpec(memory_space=pl.ANY),                          # emb table in HBM
        pl.BlockSpec((L, Bp, Hp), lambda i, tok_s: (0, 0, 0)),      # hidden state
    ]
    for l in range(L):
        w_shape = prepared["w_fused"][l].shape
        gru_in_specs.append(pl.BlockSpec(w_shape, lambda i, tok_s: (0, 0)))
    for l in range(L):
        gru_in_specs.append(pl.BlockSpec((1, 4 * Hp), lambda i, tok_s: (0, 0)))

    gru_out_specs = (
        pl.BlockSpec((L, Bp, Hp), lambda i, tok_s: (0, 0, 0)),      # new hidden
        pl.BlockSpec((Bp, Hp), lambda i, tok_s: (0, 0)),            # last-layer hidden
    )
    gru_out_shape = (jax.ShapeDtypeStruct((L, Bp, Hp), jnp.float32),
                     jax.ShapeDtypeStruct((Bp, Hp), jnp.float32))

    gru_scratch = [
        pltpu.VMEM((Bp, in_pad), jnp.float32),    # gathered embeddings
        pltpu.SemaphoreType.DMA((batch,)),
    ]

    gru_w_bytes = sum(int(w.size) for w in prepared["w_fused"]) * bf16b
    gru_b_bytes = sum(int(b.size) for b in prepared["b_fused"]) * f32b
    gru_vmem_needed = (2 * L * Bp * Hp * f32b
                       + 2 * (gru_w_bytes + gru_b_bytes)
                       + 2 * (L * Bp * Hp + Bp * Hp) * f32b
                       + Bp * in_pad * f32b)
    gru_cost = pl.CostEstimate(
        flops=int(2 * Bp * sum(int(w.size) for w in prepared["w_fused"])),
        transcendentals=int(3 * L * Bp * Hp),
        bytes_accessed=int(batch * in_pad * f32b + gru_w_bytes + gru_b_bytes
                           + 3 * L * Bp * Hp * f32b + Bp * Hp * f32b))

    h_new_p, h_last = pl.pallas_call(
        gru_kernel,
        out_shape=gru_out_shape,
        grid_spec=pltpu.PrefetchScalarGridSpec(
            num_scalar_prefetch=1,
            grid=(1,),
            in_specs=gru_in_specs,
            out_specs=gru_out_specs,
            scratch_shapes=gru_scratch),
        compiler_params=pltpu.CompilerParams(
            dimension_semantics=("arbitrary",),
            vmem_limit_bytes=_vmem_limit(gru_vmem_needed)),
        cost_estimate=gru_cost,
    )(tok, prepared["emb"], h_pad,
      *prepared["w_fused"], *prepared["b_fused"])

    # --------------- call 2: output head, vocab-tiled, megacore-parallel -------
    head_vmem_needed = (2 * Bp * Hp * f32b
                        + 2 * (Hp * TV * bf16b + TV * f32b)
                        + 2 * Bp * TV * f32b)
    head_cost = pl.CostEstimate(
        flops=int(2 * Bp * Hp * Vp),
        transcendentals=0,
        bytes_accessed=int(Hp * Vp * bf16b + Vp * f32b
                           + Bp * Vp * f32b + Bp * Hp * f32b))

    logits_p = pl.pallas_call(
        head_kernel,
        out_shape=jax.ShapeDtypeStruct((Bp, Vp), jnp.float32),
        grid=(n_vtiles,),
        in_specs=[
            pl.BlockSpec((Bp, Hp), lambda j: (0, 0)),               # last hidden (tiny)
            pl.BlockSpec((Hp, TV), lambda j: (0, j)),               # streamed bf16 tile
            pl.BlockSpec((1, TV), lambda j: (0, j)),                # bias tile
        ],
        out_specs=pl.BlockSpec((Bp, TV), lambda j: (0, j)),         # lane-dense logits
        compiler_params=pltpu.CompilerParams(
            dimension_semantics=("parallel",),   # shards vocab tiles across TCs on v7x
            vmem_limit_bytes=_vmem_limit(head_vmem_needed)),
        cost_estimate=head_cost,
    )(h_last, prepared["w_out_t"], prepared["b_out"])

    return logits_p[:batch, :nvocab], h_new_p[:, :batch, :nhidden]


# --------------------------------------------------------------------------- #
# Parameter init + pure-JAX reference (PyTorch GRU semantics, eval-mode dropout)
# --------------------------------------------------------------------------- #
def init_params(key, ninput, nhidden, nlayers, nvocab):
    keys = jax.random.split(key, 2 + 4 * nlayers + 2)
    k_it = iter(keys)
    bound = 1.0 / jnp.sqrt(nhidden)
    params = {
        "emb": jax.random.normal(next(k_it), (nvocab, ninput), jnp.float32),
        "w_ih": [], "w_hh": [], "b_ih": [], "b_hh": [],
    }
    for l in range(nlayers):
        in_l = ninput if l == 0 else nhidden
        params["w_ih"].append(jax.random.uniform(
            next(k_it), (3 * nhidden, in_l), jnp.float32, -bound, bound))
        params["w_hh"].append(jax.random.uniform(
            next(k_it), (3 * nhidden, nhidden), jnp.float32, -bound, bound))
        params["b_ih"].append(jax.random.uniform(
            next(k_it), (3 * nhidden,), jnp.float32, -bound, bound))
        params["b_hh"].append(jax.random.uniform(
            next(k_it), (3 * nhidden,), jnp.float32, -bound, bound))
    params["w_out"] = jax.random.uniform(
        next(k_it), (nvocab, nhidden), jnp.float32, -bound, bound)
    params["b_out"] = jax.random.uniform(
        next(k_it), (nvocab,), jnp.float32, -bound, bound)
    return params


def reference_forward(tokens, hidden, params, nlayers, nhidden):
    H = nhidden
    hp = jax.lax.Precision.HIGHEST
    x = params["emb"][tokens[:, 0]]
    new_h = []
    for l in range(nlayers):
        h_prev = hidden[l]
        gi = jnp.dot(x, params["w_ih"][l].T, precision=hp) + params["b_ih"][l]
        gh = jnp.dot(h_prev, params["w_hh"][l].T, precision=hp) + params["b_hh"][l]
        r = jax.nn.sigmoid(gi[:, :H] + gh[:, :H])
        z = jax.nn.sigmoid(gi[:, H:2 * H] + gh[:, H:2 * H])
        n = jnp.tanh(gi[:, 2 * H:] + r * gh[:, 2 * H:])
        h_new = (1.0 - z) * n + z * h_prev
        new_h.append(h_new)
        x = h_new
    logits = jnp.dot(x, params["w_out"].T, precision=hp) + params["b_out"]
    return logits, jnp.stack(new_h, axis=0)


# --------------------------------------------------------------------------- #
# Test driver
# --------------------------------------------------------------------------- #
def _run_case(key, *, batch, ninput, nhidden, nlayers, nvocab, v_tile):
    k_tok, k_hid, k_par = jax.random.split(key, 3)
    tokens = jax.random.randint(k_tok, (batch, 1), 0, nvocab, dtype=jnp.int32)
    hidden0 = jax.random.normal(k_hid, (nlayers, batch, nhidden), jnp.float32)
    params = init_params(k_par, ninput, nhidden, nlayers, nvocab)

    prepared, meta = prepare_params(
        params, ninput=ninput, nhidden=nhidden, nlayers=nlayers, nvocab=nvocab,
        v_tile=v_tile)

    logits, hidden1 = event_lm_forward(tokens, hidden0, prepared, **meta)
    jax.block_until_ready((logits, hidden1))

    ref_logits, ref_hidden = reference_forward(tokens, hidden0, params,
                                               nlayers, nhidden)
    assert logits.shape == (batch, nvocab)
    assert hidden1.shape == (nlayers, batch, nhidden)
    # bf16 weight storage (f32 accumulation) vs. pure-f32 reference -> loose tol.
    max_logit_err = float(jnp.max(jnp.abs(logits - ref_logits)))
    max_hidden_err = float(jnp.max(jnp.abs(hidden1 - ref_hidden)))
    assert jnp.allclose(logits, ref_logits, atol=5e-2, rtol=5e-2), max_logit_err
    assert jnp.allclose(hidden1, ref_hidden, atol=5e-2, rtol=5e-2), max_hidden_err


if __name__ == "__main__":
    root = jax.random.PRNGKey(0)
    k1, k2 = jax.random.split(root)
    # case 1: module-like small shapes (single vocab tile)
    _run_case(k1, batch=4, ninput=32, nhidden=32, nlayers=2, nvocab=64, v_tile=2048)
    # case 2: ragged batch + multi-tile vocab head (exercises the parallel head grid)
    _run_case(k2, batch=3, ninput=16, nhidden=32, nlayers=1, nvocab=300, v_tile=128)
    print("KERNEL_OK")
</pallas_src>

<mosaic_0001>
module attributes {stable_mosaic.version = 11 : i64} {
  func.func @head_kernel(%arg0: i32, %arg1: memref<8x128xf32, #tpu.memory_space<vmem>>, %arg2: memref<128x128xbf16, #tpu.memory_space<vmem>>, %arg3: memref<1x128xf32, #tpu.memory_space<vmem>>, %arg4: memref<8x128xf32, #tpu.memory_space<vmem>>) attributes {dimension_semantics = [#tpu.dimension_semantics<parallel>], iteration_bounds = array<i64: 1>, scalar_prefetch = 0 : i64, scratch_operands = 0 : i64, tpu.core_type = #tpu.core_type<tc>, window_params = [{pipeline_mode = #tpu.pipeline_mode<synchronous>, transform_indices = @transform_0, window_bounds = array<i64: 8, 128>}, {transform_indices = @transform_1, window_bounds = array<i64: 128, 128>}, {transform_indices = @transform_2, window_bounds = array<i64: 1, 128>}, {transform_indices = @transform_3, window_bounds = array<i64: 8, 128>}]} {
    %c0 = arith.constant 0 : index
    %c0_0 = arith.constant 0 : index
    %0 = vector.load %arg1[%c0, %c0_0] : memref<8x128xf32, #tpu.memory_space<vmem>>, vector<8x128xf32>
    %1 = arith.truncf %0 : vector<8x128xf32> to vector<8x128xbf16>
    %c0_1 = arith.constant 0 : index
    %c0_2 = arith.constant 0 : index
    %2 = vector.load %arg2[%c0_1, %c0_2] : memref<128x128xbf16, #tpu.memory_space<vmem>>, vector<128x128xbf16>
    %cst = arith.constant dense<0.000000e+00> : vector<8x128xf32>
    %3 = tpu.matmul %1, %2, %cst {dimension_numbers = #tpu.dot_dimension_numbers<[1], [0], [0], [1], [0, 0, 1, 1], [], []>} : vector<8x128xbf16>, vector<128x128xbf16>, vector<8x128xf32> -> vector<8x128xf32>
    %c0_3 = arith.constant 0 : index
    %c0_4 = arith.constant 0 : index
    %4 = vector.load %arg3[%c0_3, %c0_4] : memref<1x128xf32, #tpu.memory_space<vmem>>, vector<1x128xf32>
    %5 = vector.broadcast %4 : vector<1x128xf32> to vector<8x128xf32>
    %6 = arith.addf %3, %5 : vector<8x128xf32>
    %c0_5 = arith.constant 0 : index
    %c0_6 = arith.constant 0 : index
    %7 = vector.load %arg4[%c0_5, %c0_6] : memref<8x128xf32, #tpu.memory_space<vmem>>, vector<8x128xf32>
    tpu.vector_store %arg4[%c0_5, %c0_6], %6 {strides = array<i32>} : memref<8x128xf32, #tpu.memory_space<vmem>>, vector<8x128xf32>,
    return
  }
  func.func @transform_0(%arg0: i32) -> (i32, i32) {
    %c0_i32 = arith.constant 0 : i32
    %c0_i32_0 = arith.constant 0 : i32
    %c0_i32_1 = arith.constant 0 : i32
    return %c0_i32, %c0_i32_0 : i32, i32
  }
  func.func @transform_1(%arg0: i32) -> (i32, i32) {
    %c0_i32 = arith.constant 0 : i32
    %c0_i32_0 = arith.constant 0 : i32
    return %c0_i32, %arg0 : i32, i32
  }
  func.func @transform_2(%arg0: i32) -> (i32, i32) {
    %c0_i32 = arith.constant 0 : i32
    %c0_i32_0 = arith.constant 0 : i32
    return %c0_i32, %arg0 : i32, i32
  }
  func.func @transform_3(%arg0: i32) -> (i32, i32) {
    %c0_i32 = arith.constant 0 : i32
    %c0_i32_0 = arith.constant 0 : i32
    return %c0_i32, %arg0 : i32, i32
  }
}

module attributes {stable_mosaic.version = 11 : i64} {
  func.func @kernel(%arg0: i32, %arg1: memref<8xi32, #tpu.memory_space<smem>>, %arg2: memref<64x128xf32, #tpu.memory_space<any>>, %arg3: memref<2x8x128xf32, #tpu.memory_space<vmem>>, %arg4: memref<256x512xbf16, #tpu.memory_space<vmem>>, %arg5: memref<256x512xbf16, #tpu.memory_space<vmem>>, %arg6: memref<1x512xf32, #tpu.memory_space<vmem>>, %arg7: memref<1x512xf32, #tpu.memory_space<vmem>>, %arg8: memref<2x8x128xf32, #tpu.memory_space<vmem>>, %arg9: memref<8x128xf32, #tpu.memory_space<vmem>>, %arg10: memref<8x128xf32, #tpu.memory_space<vmem>>, %arg11: memref<4x!tpu.dma_semaphore, #tpu.memory_space<semaphore_mem>>) attributes {dimension_semantics = [#tpu.dimension_semantics<arbitrary>], iteration_bounds = array<i64: 1>, scalar_prefetch = 1 : i64, scratch_operands = 2 : i64, tpu.core_type = #tpu.core_type<tc>, window_params = [{}, {pipeline_mode = #tpu.pipeline_mode<synchronous>, transform_indices = @transform_1, window_bounds = array<i64: 2, 8, 128>}, {pipeline_mode = #tpu.pipeline_mode<synchronous>, transform_indices = @transform_2, window_bounds = array<i64: 256, 512>}, {pipeline_mode = #tpu.pipeline_mode<synchronous>, transform_indices = @transform_3, window_bounds = array<i64: 256, 512>}, {pipeline_mode = #tpu.pipeline_mode<synchronous>, transform_indices = @transform_4, window_bounds = array<i64: 1, 512>}, {pipeline_mode = #tpu.pipeline_mode<synchronous>, transform_indices = @transform_5, window_bounds = array<i64: 1, 512>}, {pipeline_mode = #tpu.pipeline_mode<synchronous>, transform_indices = @transform_6, window_bounds = array<i64: 2, 8, 128>}, {pipeline_mode = #tpu.pipeline_mode<synchronous>, transform_indices = @transform_7, window_bounds = array<i64: 8, 128>}]} {
    %cst = arith.constant 0.000000e+00 : f32
    %0 = vector.broadcast %cst : f32 to vector<4x128xf32>
    %c4 = arith.constant 4 : index
    %c0 = arith.constant 0 : index
    %1 = vector.load %arg10[%c4, %c0] : memref<8x128xf32, #tpu.memory_space<vmem>>, vector<4x128xf32>
    tpu.vector_store %arg10[%c4, %c0], %0 {strides = array<i32>} : memref<8x128xf32, #tpu.memory_space<vmem>>, vector<4x128xf32>,
    %c0_0 = arith.constant 0 : index
    %2 = memref.load %arg1[%c0_0] : memref<8xi32, #tpu.memory_space<smem>>
    %c0_i32 = arith.constant 0 : i32
    %c63_i32 = arith.constant 63 : i32
    %3 = arith.maxsi %c0_i32, %2 : i32
    %4 = arith.minsi %c63_i32, %3 : i32
    %c0_i32_1 = arith.constant 0 : i32
    %c0_i32_2 = arith.constant 0 : i32
    %5 = tpu.memref_slice %arg2[%4, %c0_i32_2] : memref<64x128xf32, #tpu.memory_space<any>> -> memref<1x128xf32, #tpu.memory_space<any>>
    %c0_i32_3 = arith.constant 0 : i32
    %c0_i32_4 = arith.constant 0 : i32
    %6 = tpu.memref_slice %arg10[%c0_i32_3, %c0_i32_4] : memref<8x128xf32, #tpu.memory_space<vmem>> -> memref<1x128xf32, #tpu.memory_space<vmem>>
    %7 = tpu.memref_slice %arg11[%c0_i32_1] : memref<4x!tpu.dma_semaphore, #tpu.memory_space<semaphore_mem>> -> memref<1x!tpu.dma_semaphore, #tpu.memory_space<semaphore_mem>>
    %8 = tpu.memref_squeeze %7 : memref<1x!tpu.dma_semaphore, #tpu.memory_space<semaphore_mem>> -> memref<!tpu.dma_semaphore, #tpu.memory_space<semaphore_mem>>
    tpu.enqueue_dma source(%5 : memref<1x128xf32, #tpu.memory_space<any>>) target(%6 : memref<1x128xf32, #tpu.memory_space<vmem>>) target_semaphore(%8 : memref<!tpu.dma_semaphore, #tpu.memory_space<semaphore_mem>>)
    %c1 = arith.constant 1 : index
    %9 = memref.load %arg1[%c1] : memref<8xi32, #tpu.memory_space<smem>>
    %c0_i32_5 = arith.constant 0 : i32
    %c63_i32_6 = arith.constant 63 : i32
    %10 = arith.maxsi %c0_i32_5, %9 : i32
    %11 = arith.minsi %c63_i32_6, %10 : i32
    %c1_i32 = arith.constant 1 : i32
    %c0_i32_7 = arith.constant 0 : i32
    %12 = tpu.memref_slice %arg2[%11, %c0_i32_7] : memref<64x128xf32, #tpu.memory_space<any>> -> memref<1x128xf32, #tpu.memory_space<any>>
    %c1_i32_8 = arith.constant 1 : i32
    %c0_i32_9 = arith.constant 0 : i32
    %13 = tpu.memref_slice %arg10[%c1_i32_8, %c0_i32_9] : memref<8x128xf32, #tpu.memory_space<vmem>> -> memref<1x128xf32, #tpu.memory_space<vmem>>
    %14 = tpu.memref_slice %arg11[%c1_i32] : memref<4x!tpu.dma_semaphore, #tpu.memory_space<semaphore_mem>> -> memref<1x!tpu.dma_semaphore, #tpu.memory_space<semaphore_mem>>
    %15 = tpu.memref_squeeze %14 : memref<1x!tpu.dma_semaphore, #tpu.memory_space<semaphore_mem>> -> memref<!tpu.dma_semaphore, #tpu.memory_space<semaphore_mem>>
    tpu.enqueue_dma source(%12 : memref<1x128xf32, #tpu.memory_space<any>>) target(%13 : memref<1x128xf32, #tpu.memory_space<vmem>>) target_semaphore(%15 : memref<!tpu.dma_semaphore, #tpu.memory_space<semaphore_mem>>)
    %c2 = arith.constant 2 : index
    %16 = memref.load %arg1[%c2] : memref<8xi32, #tpu.memory_space<smem>>
    %c0_i32_10 = arith.constant 0 : i32
    %c63_i32_11 = arith.constant 63 : i32
    %17 = arith.maxsi %c0_i32_10, %16 : i32
    %18 = arith.minsi %c63_i32_11, %17 : i32
    %c2_i32 = arith.constant 2 : i32
    %c0_i32_12 = arith.constant 0 : i32
    %19 = tpu.memref_slice %arg2[%18, %c0_i32_12] : memref<64x128xf32, #tpu.memory_space<any>> -> memref<1x128xf32, #tpu.memory_space<any>>
    %c2_i32_13 = arith.constant 2 : i32
    %c0_i32_14 = arith.constant 0 : i32
    %20 = tpu.memref_slice %arg10[%c2_i32_13, %c0_i32_14] : memref<8x128xf32, #tpu.memory_space<vmem>> -> memref<1x128xf32, #tpu.memory_space<vmem>>
    %21 = tpu.memref_slice %arg11[%c2_i32] : memref<4x!tpu.dma_semaphore, #tpu.memory_space<semaphore_mem>> -> memref<1x!tpu.dma_semaphore, #tpu.memory_space<semaphore_mem>>
    %22 = tpu.memref_squeeze %21 : memref<1x!tpu.dma_semaphore, #tpu.memory_space<semaphore_mem>> -> memref<!tpu.dma_semaphore, #tpu.memory_space<semaphore_mem>>
    tpu.enqueue_dma source(%19 : memref<1x128xf32, #tpu.memory_space<any>>) target(%20 : memref<1x128xf32, #tpu.memory_space<vmem>>) target_semaphore(%22 : memref<!tpu.dma_semaphore, #tpu.memory_space<semaphore_mem>>)
    %c3 = arith.constant 3 : index
    %23 = memref.load %arg1[%c3] : memref<8xi32, #tpu.memory_space<smem>>
    %c0_i32_15 = arith.constant 0 : i32
    %c63_i32_16 = arith.constant 63 : i32
    %24 = arith.maxsi %c0_i32_15, %23 : i32
    %25 = arith.minsi %c63_i32_16, %24 : i32
    %c3_i32 = arith.constant 3 : i32
    %c0_i32_17 = arith.constant 0 : i32
    %26 = tpu.memref_slice %arg2[%25, %c0_i32_17] : memref<64x128xf32, #tpu.memory_space<any>> -> memref<1x128xf32, #tpu.memory_space<any>>
    %c3_i32_18 = arith.constant 3 : i32
    %c0_i32_19 = arith.constant 0 : i32
    %27 = tpu.memref_slice %arg10[%c3_i32_18, %c0_i32_19] : memref<8x128xf32, #tpu.memory_space<vmem>> -> memref<1x128xf32, #tpu.memory_space<vmem>>
    %28 = tpu.memref_slice %arg11[%c3_i32] : memref<4x!tpu.dma_semaphore, #tpu.memory_space<semaphore_mem>> -> memref<1x!tpu.dma_semaphore, #tpu.memory_space<semaphore_mem>>
    %29 = tpu.memref_squeeze %28 : memref<1x!tpu.dma_semaphore, #tpu.memory_space<semaphore_mem>> -> memref<!tpu.dma_semaphore, #tpu.memory_space<semaphore_mem>>
    tpu.enqueue_dma source(%26 : memref<1x128xf32, #tpu.memory_space<any>>) target(%27 : memref<1x128xf32, #tpu.memory_space<vmem>>) target_semaphore(%29 : memref<!tpu.dma_semaphore, #tpu.memory_space<semaphore_mem>>)
    %c0_i32_20 = arith.constant 0 : i32
    %c0_i32_21 = arith.constant 0 : i32
    %30 = tpu.memref_slice %arg2[%4, %c0_i32_21] : memref<64x128xf32, #tpu.memory_space<any>> -> memref<1x128xf32, #tpu.memory_space<any>>
    %c0_i32_22 = arith.constant 0 : i32
    %c0_i32_23 = arith.constant 0 : i32
    %31 = tpu.memref_slice %arg10[%c0_i32_22, %c0_i32_23] : memref<8x128xf32, #tpu.memory_space<vmem>> -> memref<1x128xf32, #tpu.memory_space<vmem>>
    %32 = tpu.memref_slice %arg11[%c0_i32_20] : memref<4x!tpu.dma_semaphore, #tpu.memory_space<semaphore_mem>> -> memref<1x!tpu.dma_semaphore, #tpu.memory_space<semaphore_mem>>
    %33 = tpu.memref_squeeze %32 : memref<1x!tpu.dma_semaphore, #tpu.memory_space<semaphore_mem>> -> memref<!tpu.dma_semaphore, #tpu.memory_space<semaphore_mem>>
    tpu.wait_dma2 semaphore(%33 : memref<!tpu.dma_semaphore, #tpu.memory_space<semaphore_mem>>) src(%30 : memref<1x128xf32, #tpu.memory_space<any>>) dst(%31 : memref<1x128xf32, #tpu.memory_space<vmem>>)
    %c1_i32_24 = arith.constant 1 : i32
    %c0_i32_25 = arith.constant 0 : i32
    %34 = tpu.memref_slice %arg2[%11, %c0_i32_25] : memref<64x128xf32, #tpu.memory_space<any>> -> memref<1x128xf32, #tpu.memory_space<any>>
    %c1_i32_26 = arith.constant 1 : i32
    %c0_i32_27 = arith.constant 0 : i32
    %35 = tpu.memref_slice %arg10[%c1_i32_26, %c0_i32_27] : memref<8x128xf32, #tpu.memory_space<vmem>> -> memref<1x128xf32, #tpu.memory_space<vmem>>
    %36 = tpu.memref_slice %arg11[%c1_i32_24] : memref<4x!tpu.dma_semaphore, #tpu.memory_space<semaphore_mem>> -> memref<1x!tpu.dma_semaphore, #tpu.memory_space<semaphore_mem>>
    %37 = tpu.memref_squeeze %36 : memref<1x!tpu.dma_semaphore, #tpu.memory_space<semaphore_mem>> -> memref<!tpu.dma_semaphore, #tpu.memory_space<semaphore_mem>>
    tpu.wait_dma2 semaphore(%37 : memref<!tpu.dma_semaphore, #tpu.memory_space<semaphore_mem>>) src(%34 : memref<1x128xf32, #tpu.memory_space<any>>) dst(%35 : memref<1x128xf32, #tpu.memory_space<vmem>>)
    %c2_i32_28 = arith.constant 2 : i32
    %c0_i32_29 = arith.constant 0 : i32
    %38 = tpu.memref_slice %arg2[%18, %c0_i32_29] : memref<64x128xf32, #tpu.memory_space<any>> -> memref<1x128xf32, #tpu.memory_space<any>>
    %c2_i32_30 = arith.constant 2 : i32
    %c0_i32_31 = arith.constant 0 : i32
    %39 = tpu.memref_slice %arg10[%c2_i32_30, %c0_i32_31] : memref<8x128xf32, #tpu.memory_space<vmem>> -> memref<1x128xf32, #tpu.memory_space<vmem>>
    %40 = tpu.memref_slice %arg11[%c2_i32_28] : memref<4x!tpu.dma_semaphore, #tpu.memory_space<semaphore_mem>> -> memref<1x!tpu.dma_semaphore, #tpu.memory_space<semaphore_mem>>
    %41 = tpu.memref_squeeze %40 : memref<1x!tpu.dma_semaphore, #tpu.memory_space<semaphore_mem>> -> memref<!tpu.dma_semaphore, #tpu.memory_space<semaphore_mem>>
    tpu.wait_dma2 semaphore(%41 : memref<!tpu.dma_semaphore, #tpu.memory_space<semaphore_mem>>) src(%38 : memref<1x128xf32, #tpu.memory_space<any>>) dst(%39 : memref<1x128xf32, #tpu.memory_space<vmem>>)
    %c3_i32_32 = arith.constant 3 : i32
    %c0_i32_33 = arith.constant 0 : i32
    %42 = tpu.memref_slice %arg2[%25, %c0_i32_33] : memref<64x128xf32, #tpu.memory_space<any>> -> memref<1x128xf32, #tpu.memory_space<any>>
    %c3_i32_34 = arith.constant 3 : i32
    %c0_i32_35 = arith.constant 0 : i32
    %43 = tpu.memref_slice %arg10[%c3_i32_34, %c0_i32_35] : memref<8x128xf32, #tpu.memory_space<vmem>> -> memref<1x128xf32, #tpu.memory_space<vmem>>
    %44 = tpu.memref_slice %arg11[%c3_i32_32] : memref<4x!tpu.dma_semaphore, #tpu.memory_space<semaphore_mem>> -> memref<1x!tpu.dma_semaphore, #tpu.memory_space<semaphore_mem>>
    %45 = tpu.memref_squeeze %44 : memref<1x!tpu.dma_semaphore, #tpu.memory_space<semaphore_mem>> -> memref<!tpu.dma_semaphore, #tpu.memory_space<semaphore_mem>>
    tpu.wait_dma2 semaphore(%45 : memref<!tpu.dma_semaphore, #tpu.memory_space<semaphore_mem>>) src(%42 : memref<1x128xf32, #tpu.memory_space<any>>) dst(%43 : memref<1x128xf32, #tpu.memory_space<vmem>>)
    %c0_36 = arith.constant 0 : index
    %c0_37 = arith.constant 0 : index
    %46 = vector.load %arg10[%c0_36, %c0_37] : memref<8x128xf32, #tpu.memory_space<vmem>>, vector<8x128xf32>
    %c0_38 = arith.constant 0 : index
    %c0_39 = arith.constant 0 : index
    %c0_40 = arith.constant 0 : index
    %47 = vector.load %arg3[%c0_38, %c0_39, %c0_40] : memref<2x8x128xf32, #tpu.memory_space<vmem>>, vector<1x8x128xf32>
    %48 = vector.shape_cast %47 : vector<1x8x128xf32> to vector<8x128xf32>
    %49 = tpu.concatenate %46, %48 in 1 : vector<8x128xf32>, vector<8x128xf32> -> vector<8x256xf32>
    %50 = arith.truncf %49 : vector<8x256xf32> to vector<8x256xbf16>
    %c0_41 = arith.constant 0 : index
    %c0_42 = arith.constant 0 : index
    %51 = vector.load %arg4[%c0_41, %c0_42] : memref<256x512xbf16, #tpu.memory_space<vmem>>, vector<256x512xbf16>
    %cst_43 = arith.constant dense<0.000000e+00> : vector<8x512xf32>
    %52 = tpu.matmul %50, %51, %cst_43 {dimension_numbers = #tpu.dot_dimension_numbers<[1], [0], [0], [1], [0, 0, 1, 1], [], []>} : vector<8x256xbf16>, vector<256x512xbf16>, vector<8x512xf32> -> vector<8x512xf32>
    %c0_44 = arith.constant 0 : index
    %c0_45 = arith.constant 0 : index
    %53 = vector.load %arg6[%c0_44, %c0_45] : memref<1x512xf32, #tpu.memory_space<vmem>>, vector<1x512xf32>
    %54 = vector.broadcast %53 : vector<1x512xf32> to vector<8x512xf32>
    %55 = arith.addf %52, %54 : vector<8x512xf32>
    %56 = vector.extract_strided_slice %55 {offsets = [0, 0], sizes = [8, 128], strides = [1, 1]} : vector<8x512xf32> to vector<8x128xf32>
    %57 = arith.negf %56 : vector<8x128xf32>
    %58 = math.exp %57 : vector<8x128xf32>
    %cst_46 = arith.constant 1.000000e+00 : f32
    %59 = vector.broadcast %cst_46 : f32 to vector<8x128xf32>
    %60 = arith.addf %59, %58 : vector<8x128xf32>
    %61 = arith.divf %59, %60 : vector<8x128xf32>
    %62 = vector.extract_strided_slice %55 {offsets = [0, 128], sizes = [8, 128], strides = [1, 1]} : vector<8x512xf32> to vector<8x128xf32>
    %63 = arith.negf %62 : vector<8x128xf32>
    %64 = math.exp %63 : vector<8x128xf32>
    %cst_47 = arith.constant 1.000000e+00 : f32
    %65 = vector.broadcast %cst_47 : f32 to vector<8x128xf32>
    %66 = arith.addf %65, %64 : vector<8x128xf32>
    %67 = arith.divf %65, %66 : vector<8x128xf32>
    %68 = vector.extract_strided_slice %55 {offsets = [0, 256], sizes = [8, 128], strides = [1, 1]} : vector<8x512xf32> to vector<8x128xf32>
    %69 = vector.extract_strided_slice %55 {offsets = [0, 384], sizes = [8, 128], strides = [1, 1]} : vector<8x512xf32> to vector<8x128xf32>
    %70 = arith.mulf %61, %69 : vector<8x128xf32>
    %71 = arith.addf %68, %70 : vector<8x128xf32>
    %72 = math.tanh %71 : vector<8x128xf32>
    %cst_48 = arith.constant 1.000000e+00 : f32
    %73 = vector.broadcast %cst_48 : f32 to vector<8x128xf32>
    %74 = arith.subf %73, %67 : vector<8x128xf32>
    %75 = arith.mulf %74, %72 : vector<8x128xf32>
    %76 = arith.mulf %67, %48 : vector<8x128xf32>
    %77 = arith.addf %75, %76 : vector<8x128xf32>
    %c0_49 = arith.constant 0 : index
    %c0_50 = arith.constant 0 : index
    %c0_51 = arith.constant 0 : index
    %78 = vector.load %arg8[%c0_49, %c0_50, %c0_51] : memref<2x8x128xf32, #tpu.memory_space<vmem>>, vector<1x8x128xf32>
    %79 = vector.shape_cast %78 : vector<1x8x128xf32> to vector<8x128xf32>
    %80 = vector.shape_cast %77 : vector<8x128xf32> to vector<1x8x128xf32>
    tpu.vector_store %arg8[%c0_49, %c0_50, %c0_51], %80 {strides = array<i32>} : memref<2x8x128xf32, #tpu.memory_space<vmem>>, vector<1x8x128xf32>,
    %c1_52 = arith.constant 1 : index
    %c0_53 = arith.constant 0 : index
    %c0_54 = arith.constant 0 : index
    %81 = vector.load %arg3[%c1_52, %c0_53, %c0_54] : memref<2x8x128xf32, #tpu.memory_space<vmem>>, vector<1x8x128xf32>
    %82 = vector.shape_cast %81 : vector<1x8x128xf32> to vector<8x128xf32>
    %83 = tpu.concatenate %77, %82 in 1 : vector<8x128xf32>, vector<8x128xf32> -> vector<8x256xf32>
    %84 = arith.truncf %83 : vector<8x256xf32> to vector<8x256xbf16>
    %c0_55 = arith.constant 0 : index
    %c0_56 = arith.constant 0 : index
    %85 = vector.load %arg5[%c0_55, %c0_56] : memref<256x512xbf16, #tpu.memory_space<vmem>>, vector<256x512xbf16>
    %cst_57 = arith.constant dense<0.000000e+00> : vector<8x512xf32>
    %86 = tpu.matmul %84, %85, %cst_57 {dimension_numbers = #tpu.dot_dimension_numbers<[1], [0], [0], [1], [0, 0, 1, 1], [], []>} : vector<8x256xbf16>, vector<256x512xbf16>, vector<8x512xf32> -> vector<8x512xf32>
    %c0_58 = arith.constant 0 : index
    %c0_59 = arith.constant 0 : index
    %87 = vector.load %arg7[%c0_58, %c0_59] : memref<1x512xf32, #tpu.memory_space<vmem>>, vector<1x512xf32>
    %88 = vector.broadcast %87 : vector<1x512xf32> to vector<8x512xf32>
    %89 = arith.addf %86, %88 : vector<8x512xf32>
    %90 = vector.extract_strided_slice %89 {offsets = [0, 0], sizes = [8, 128], strides = [1, 1]} : vector<8x512xf32> to vector<8x128xf32>
    %91 = arith.negf %90 : vector<8x128xf32>
    %92 = math.exp %91 : vector<8x128xf32>
    %cst_60 = arith.constant 1.000000e+00 : f32
    %93 = vector.broadcast %cst_60 : f32 to vector<8x128xf32>
    %94 = arith.addf %93, %92 : vector<8x128xf32>
    %95 = arith.divf %93, %94 : vector<8x128xf32>
    %96 = vector.extract_strided_slice %89 {offsets = [0, 128], sizes = [8, 128], strides = [1, 1]} : vector<8x512xf32> to vector<8x128xf32>
    %97 = arith.negf %96 : vector<8x128xf32>
    %98 = math.exp %97 : vector<8x128xf32>
    %cst_61 = arith.constant 1.000000e+00 : f32
    %99 = vector.broadcast %cst_61 : f32 to vector<8x128xf32>
    %100 = arith.addf %99, %98 : vector<8x128xf32>
    %101 = arith.divf %99, %100 : vector<8x128xf32>
    %102 = vector.extract_strided_slice %89 {offsets = [0, 256], sizes = [8, 128], strides = [1, 1]} : vector<8x512xf32> to vector<8x128xf32>
    %103 = vector.extract_strided_slice %89 {offsets = [0, 384], sizes = [8, 128], strides = [1, 1]} : vector<8x512xf32> to vector<8x128xf32>
    %104 = arith.mulf %95, %103 : vector<8x128xf32>
    %105 = arith.addf %102, %104 : vector<8x128xf32>
    %106 = math.tanh %105 : vector<8x128xf32>
    %cst_62 = arith.constant 1.000000e+00 : f32
    %107 = vector.broadcast %cst_62 : f32 to vector<8x128xf32>
    %108 = arith.subf %107, %101 : vector<8x128xf32>
    %109 = arith.mulf %108, %106 : vector<8x128xf32>
    %110 = arith.mulf %101, %82 : vector<8x128xf32>
    %111 = arith.addf %109, %110 : vector<8x128xf32>
    %c1_63 = arith.constant 1 : index
    %c0_64 = arith.constant 0 : index
    %c0_65 = arith.constant 0 : index
    %112 = vector.load %arg8[%c1_63, %c0_64, %c0_65] : memref<2x8x128xf32, #tpu.memory_space<vmem>>, vector<1x8x128xf32>
    %113 = vector.shape_cast %112 : vector<1x8x128xf32> to vector<8x128xf32>
    %114 = vector.shape_cast %111 : vector<8x128xf32> to vector<1x8x128xf32>
    tpu.vector_store %arg8[%c1_63, %c0_64, %c0_65], %114 {strides = array<i32>} : memref<2x8x128xf32, #tpu.memory_space<vmem>>, vector<1x8x128xf32>,
    %c0_66 = arith.constant 0 : index
    %c0_67 = arith.constant 0 : index
    %115 = vector.load %arg9[%c0_66, %c0_67] : memref<8x128xf32, #tpu.memory_space<vmem>>, vector<8x128xf32>
    tpu.vector_store %arg9[%c0_66, %c0_67], %111 {strides = array<i32>} : memref<8x128xf32, #tpu.memory_space<vmem>>, vector<8x128xf32>,
    return
  }
  func.func @transform_1(%arg0: i32, %arg1: memref<8xi32, #tpu.memory_space<smem>>) -> (i32, i32, i32) {
    %c0_i32 = arith.constant 0 : i32
    %c0_i32_0 = arith.constant 0 : i32
    %c0_i32_1 = arith.constant 0 : i32
    %c0_i32_2 = arith.constant 0 : i32
    return %c0_i32, %c0_i32_0, %c0_i32_1 : i32, i32, i32
  }
  func.func @transform_2(%arg0: i32, %arg1: memref<8xi32, #tpu.memory_space<smem>>) -> (i32, i32) {
    %c0_i32 = arith.constant 0 : i32
    %c0_i32_0 = arith.constant 0 : i32
    %c0_i32_1 = arith.constant 0 : i32
    return %c0_i32, %c0_i32_0 : i32, i32
  }
  func.func @transform_3(%arg0: i32, %arg1: memref<8xi32, #tpu.memory_space<smem>>) -> (i32, i32) {
    %c0_i32 = arith.constant 0 : i32
    %c0_i32_0 = arith.constant 0 : i32
    %c0_i32_1 = arith.constant 0 : i32
    return %c0_i32, %c0_i32_0 : i32, i32
  }
  func.func @transform_4(%arg0: i32, %arg1: memref<8xi32, #tpu.memory_space<smem>>) -> (i32, i32) {
    %c0_i32 = arith.constant 0 : i32
    %c0_i32_0 = arith.constant 0 : i32
    %c0_i32_1 = arith.constant 0 : i32
    return %c0_i32, %c0_i32_0 : i32, i32
  }
  func.func @transform_5(%arg0: i32, %arg1: memref<8xi32, #tpu.memory_space<smem>>) -> (i32, i32) {
    %c0_i32 = arith.constant 0 : i32
    %c0_i32_0 = arith.constant 0 : i32
    %c0_i32_1 = arith.constant 0 : i32
    return %c0_i32, %c0_i32_0 : i32, i32
  }
  func.func @transform_6(%arg0: i32, %arg1: memref<8xi32, #tpu.memory_space<smem>>) -> (i32, i32, i32) {
    %c0_i32 = arith.constant 0 : i32
    %c0_i32_0 = arith.constant 0 : i32
    %c0_i32_1 = arith.constant 0 : i32
    %c0_i32_2 = arith.constant 0 : i32
    return %c0_i32, %c0_i32_0, %c0_i32_1 : i32, i32, i32
  }
  func.func @transform_7(%arg0: i32, %arg1: memref<8xi32, #tpu.memory_space<smem>>) -> (i32, i32) {
    %c0_i32 = arith.constant 0 : i32
    %c0_i32_0 = arith.constant 0 : i32
    %c0_i32_1 = arith.constant 0 : i32
    return %c0_i32, %c0_i32_0 : i32, i32
  }
}

</mosaic_0001>

<bundles_post_ra>
// kernel: event_lm_forward.3
= control target key start
LH: loop header
LB: loop body
LE: loop exit
PB: predicated region body
PF: predicated region fallthrough
CT: control target
= control target key end

     0   :  { %v181_v0 = vmov 0.0   ;;  %vm182_vm0 = vmmov 0   ;;  %s236_s1 = inlined_call_operand.vmem [shape: bf16[128,128], index: 1, kind: input, shape index: {}]   ;;  %s237_s0 = inlined_call_operand.vmem [shape: f32[8,128], index: 0, kind: input, shape index: {}]   ;;  %s238_s2 = inlined_call_operand.vmem [shape: f32[1,128], index: 2, kind: input, shape index: {}]   ;;  %s239_s3 = inlined_call_operand.vmem [shape: f32[8,128], index: 3, kind: output, shape index: {}]  }
   0x1   :  { %151 = vmatprep.subr.bf16.mxu0 %v181_v0  ;;  %v173_v1 = vld [vmem:[%s236_s1 + $0x38] sm:$0xff]   ;;  %167 = vmatprep.mubr.msk.bf16.mxu0 %vm182_vm0, %v181_v0  ;;  %v174_v2 = vld [vmem:[%s236_s1 + $0x30] sm:$0xff]   ;;  %v175_v3 = vld [vmem:[%s236_s1 + $0x28] sm:$0xff]  }
   0x2   :  { %152 = vmatpush3.bf16.msra.mxu0 %v173_v1  ;;  %v176_v4 = vld [vmem:[%s236_s1 + $0x20] sm:$0xff]   ;;  %v177_v5 = vld [vmem:[%s236_s1 + $0x18] sm:$0xff]   ;;  %v178_v6 = vld [vmem:[%s236_s1 + $0x10] sm:$0xff]  }
   0x3   :  { %153 = vmatprep.subr.bf16.mxu0 %v181_v0  ;;  %v179_v7 = vld [vmem:[%s236_s1 + $0x8] sm:$0xff]   ;;  %v180_v8 = vld [vmem:[%s236_s1] sm:$0xff]  }
   0x4   :  { %v15_v9 = vld [vmem:[%s237_s0] sm:$0xff] }
   0x5   :  { %v16_v10 = vpack.c.bf16 %v15_v9, %v15_v9  ;;  %v133_v11 = vld [vmem:[%s238_s2] ss:$0 sm:$0xff] }
   0x6   :  { %154 = vmatpush3.bf16.msra.mxu0 %v174_v2 }
   0x7   :  { %155 = vmatprep.subr.bf16.mxu0 %v181_v0 }
   0xa   :  { %156 = vmatpush3.bf16.msra.mxu0 %v175_v3 }
   0xb   :  { %157 = vmatprep.subr.bf16.mxu0 %v181_v0 }
   0xe   :  { %158 = vmatpush3.bf16.msra.mxu0 %v176_v4 }
   0xf   :  { %159 = vmatprep.subr.bf16.mxu0 %v181_v0 }
  0x12   :  { %160 = vmatpush3.bf16.msra.mxu0 %v177_v5 }
  0x13   :  { %161 = vmatprep.subr.bf16.mxu0 %v181_v0 }
  0x16   :  { %162 = vmatpush3.bf16.msra.mxu0 %v178_v6 }
  0x17   :  { %163 = vmatprep.subr.bf16.mxu0 %v181_v0 }
  0x1a   :  { %164 = vmatpush3.bf16.msra.mxu0 %v179_v7 }
  0x1b   :  { %165 = vmatprep.subr.bf16.mxu0 %v181_v0 }
  0x1e   :  { %166 = vmatpush3.bf16.msra.mxu0 %v180_v8 }
  0x21   :  { %168 = vmatmul.mubr.bf16.vlgmr.msra.gmra.mxu0 %v16_v10 }
  0xe1   :  { %v122_v12 = vpop.f32.mrf.mxu0 }
  0xe2   :  { %v123_v13 = vadd.f32 %v133_v11, %v122_v12 }
  0xe3   :  { %v169_v14 = vpop.f32.mrf.mxu0 }
  0xe4   :  { %128 = vst [vmem:[%s239_s3] sm:$0xff] %v123_v13 }
  0xe5   :  { %v125_v15 = vpop.f32.mrf.mxu0 }
  0xe7   :  { %v170_v16 = vpop.f32.mrf.mxu0 }

// kernel: event_lm_forward.2
= control target key start
LH: loop header
LB: loop body
LE: loop exit
PB: predicated region body
PF: predicated region fallthrough
CT: control target
= control target key end

     0   :  { %s1945_s0 = inlined_call_operand.vmem [shape: s32[8], index: 0, kind: input, shape index: {}]   ;;  %s1946_s1 = inlined_call_operand.hbm [shape: f32[64,128], index: 1, kind: input, shape index: {}]   ;;  %s1947_s2 = inlined_call_operand.vmem [shape: f32[2,8,128], index: 2, kind: input, shape index: {}]   ;;  %s1948_s3 = inlined_call_operand.hbm [shape: bf16[256,512], index: 3, kind: input, shape index: {}]   ;;  %s1949_s4 = inlined_call_operand.hbm [shape: bf16[256,512], index: 4, kind: input, shape index: {}]   ;;  %s1950_s5 = inlined_call_operand.vmem [shape: f32[1,512], index: 5, kind: input, shape index: {}]   ;;  %s1951_s6 = inlined_call_operand.vmem [shape: f32[1,512], index: 6, kind: input, shape index: {}]   ;;  %s1952_s7 = inlined_call_operand.vmem [shape: f32[2,8,128], index: 7, kind: output, shape index: {0}]   ;;  %s1953_s8 = inlined_call_operand.vmem [shape: f32[8,128], index: 8, kind: output, shape index: {1}]  }
   0x1   :  { %s14_s29 = sshll.u32 %s1945_s0, 4  ;;  %s15_s29 = int_to_ptr.vmem [resolvable:$true] %s14_s29 }
   0x2   :  { %s1612_s30 = scalar_lea.vmem %s15_s29, 16  ;;  %p1617_p1 = scmp.lt.s32.totalorder %s15_s29, %s15_s29 }
   0x3   :  { %p1613_p0 = scmp.ne.s32.totalorder %s15_s29, %s1612_s30  ;;  %p1618_p2 = scmp.lt.s32.totalorder %s1612_s30, %s1612_s30 }
   0x5   :  { %p1619_p3 = por %p1618_p2, %p1617_p1 }
   0x7   :  { %p1620_p4 = pnand %p1619_p3, %p1613_p0 }
   0x9   :  { %1623 = shalt.err (!%p1620_p4)  }
   0xa   :  { %s1766_s9 = smov [#allocation5]  }
   0xb   :  { %17 = dma.vmem_to_smem %s15_s29, 16, %s1766_s9, [#allocation4] }
   0xc   :  { %1752 = dma.done.wait [#allocation4], 16 }
   0xd   :  { %1753 = vsyncadd [#allocation4], 4294967280 }
   0xe   :  { %19 = sfence }
   0xf   :  { %20 = vsyncpa [#allocation7], 0 }
  0x10   :  { %21 = vsyncpa [#allocation9], 0  ;;  %s1767_s10 = smov [#allocation6]  }
  0x11   :  { %s29_s11 = sshll.u32 %s1767_s10, 4  ;;  %s30_s11 = int_to_ptr.vmem [resolvable:$true] %s29_s11 }
  0x12   :  { %s1632_s12 = scalar_lea.vmem %s30_s11, 8192  ;;  %p1637_p6 = scmp.lt.s32.totalorder %s30_s11, %s30_s11 }
  0x13   :  { %p1633_p5 = scmp.ne.s32.totalorder %s30_s11, %s1632_s12  ;;  %p1638_p7 = scmp.lt.s32.totalorder %s1632_s12, %s1632_s12 }
  0x15   :  { %p1639_p8 = por %p1638_p7, %p1637_p6 }
  0x17   :  { %p1640_p9 = pnand %p1639_p8, %p1633_p5 }
  0x19   :  { %1643 = shalt.err (!%p1640_p9)
}
  0x1a   :  { %s1768_s0 = smov 256   ;;  %s1769_s13 = smov 16  }
  0x1b   :  { %35 = dma.hbm_to_vmem [thread:$0]  %s1948_s3, 8192, %s30_s11, [#allocation7], %s1768_s0, %s1768_s0, %s1769_s13  }
  0x1c   :  { %s1770_s16 = smov [#allocation8]  }
  0x1d   :  { %s41_s17 = sshll.u32 %s1770_s16, 4  ;;  %s42_s17 = int_to_ptr.vmem [resolvable:$true] %s41_s17 }
  0x1e   :  { %s1652_s18 = scalar_lea.vmem %s42_s17, 8192  ;;  %p1657_p11 = scmp.lt.s32.totalorder %s42_s17, %s42_s17 }
  0x1f   :  { %p1653_p10 = scmp.ne.s32.totalorder %s42_s17, %s1652_s18  ;;  %p1658_p12 = scmp.lt.s32.totalorder %s1652_s18, %s1652_s18 }
  0x21   :  { %p1659_p13 = por %p1658_p12, %p1657_p11 }
  0x23   :  { %p1660_p0 = pnand %p1659_p13, %p1653_p10 }
  0x25   :  { %1663 = shalt.err (!%p1660_p0)
}
  0x26   :  { %47 = dma.hbm_to_vmem [thread:$0]  %s1949_s4, 8192, %s42_s17, [#allocation9], %s1768_s0, %s1768_s0, %s1769_s13  }
  0x27   :  { %1754 = dma.done.wait [#allocation7], 8192  }
  0x28   :  { %1755 = vsyncadd [#allocation7], 4294959104 }
  0x29   :  { %1756 = dma.done.wait [#allocation9], 8192  }
  0x2a   :  { %1757 = vsyncadd [#allocation9], 4294959104  ;;  %v1771_v0 = vmov 0.0   ;;  %s59_s3 = sld [smem:[#allocation5]]  ;;  %s1772_s21 = smov [#allocation2]  }
  0x2b   :  { %58 = vst [vmem:[#allocation2 + $0x4] sm:$0xf] %v1771_v0  ;;  %s73_s22 = sshll.u32 %s1772_s21, 4  ;;  %s1223_s23 = sld [smem:[#allocation5 + $0x1]]  ;;  %s1830_s22 = int_to_ptr.vmem [resolvable:$true] %s73_s22 }
  0x2c   :  { %s1773_s24 = smov [#allocation2 + $0x1]   ;;  %s1832_s26 = sld [smem:[#allocation5 + $0x2]] }
  0x2d   :  { %s93_s25 = sshll.u32 %s1773_s24, 4  ;;  %s1774_s4 = smov [#allocation2 + $0x2]   ;;  %s1834_s25 = int_to_ptr.vmem [resolvable:$true] %s93_s25 }
  0x2e   :  { %s113_s27 = sshll.u32 %s1774_s4, 4  ;;  %s1836_s28 = sld [smem:[#allocation5 + $0x3]]  ;;  %s1838_s27 = int_to_ptr.vmem [resolvable:$true] %s113_s27 }
  0x2f   :  { %s1847_s14 = scalar_lea.hbm %s1946_s1, 1024 }
  0x30   :  { %p60_p1 = scmp.gt.s32.totalorder %s59_s3, 0  ;;  %p1217_p2 = scmp.lt.s32.totalorder %s59_s3, 63 }
  0x31   :  { %p78_p3 = scmp.gt.s32.totalorder %s1223_s23, 0  ;;  %p1224_p4 = scmp.lt.s32.totalorder %s1223_s23, 63 }
  0x32   :  { %s1955_s3 = smov (!%p60_p1, %s59_s3), 0  ;;  %p98_p5 = scmp.gt.s32.totalorder %s1832_s26, 0 }
  0x33   :  { %s1957_s23 = smov (!%p78_p3, %s1223_s23), 0  ;;  %s1959_s3 = smov (!%p1217_p2, %s1955_s3), 63 }
  0x34   :  { %s1961_s23 = smov (!%p1224_p4, %s1957_s23), 63  ;;  %s1222_s29 = sshll.u32 %s1959_s3, 4 }
  0x35   :  { %s65_s10 = scalar_lea.hbm %s1946_s1, %s1222_s29  ;;  %s1229_s11 = sshll.u32 %s1961_s23, 4 }
  0x36   :  { %s1664_s12 = scalar_lea.hbm %s65_s10, 16  ;;  %p1667_p7 = scmp.lt.s32.totalorder %s65_s10, %s1946_s1 }
  0x37   :  { %p1665_p6 = scmp.ne.s32.totalorder %s65_s10, %s1664_s12  ;;  %p1668_p8 = scmp.lt.s32.totalorder %s1847_s14, %s1664_s12 }
  0x39   :  { %p1669_p9 = por %p1668_p8, %p1667_p7 }
  0x3b   :  { %p1670_p10 = pnand %p1669_p9, %p1665_p6 }
  0x3d   :  { %1673 = shalt.err (!%p1670_p10)  }
  0x3e   :  { %s1674_s17 = scalar_lea.vmem %s1830_s22, 16  ;;  %s1856_s18 = scalar_lea.vmem %s1830_s22, 128 }
  0x3f   :  { %p1675_p11 = scmp.ne.s32.totalorder %s1830_s22, %s1674_s17  ;;  %p1679_p12 = scmp.lt.s32.totalorder %s1830_s22, %s1830_s22 }
  0x40   :  { %p1680_p13 = scmp.lt.s32.totalorder %s1856_s18, %s1674_s17 }
  0x42   :  { %p1681_p0 = por %p1680_p13, %p1679_p12 }
  0x44   :  { %p1682_p1 = pnand %p1681_p0, %p1675_p11 }
  0x46   :  { %1685 = shalt.err (!%p1682_p1)  }
  0x47   :  { %76 = dma.hbm_to_vmem [thread:$0]  %s65_s10, 16, %s1830_s22, [#allocation3] }
  0x48   :  { %s83_s3 = scalar_lea.hbm %s1946_s1, %s1229_s11  ;;  %p1231_p2 = scmp.lt.s32.totalorder %s1832_s26, 63 }
  0x49   :  { %s1686_s21 = scalar_lea.hbm %s83_s3, 16  ;;  %p1689_p4 = scmp.lt.s32.totalorder %s83_s3, %s1946_s1 }
  0x4a   :  { %p1687_p3 = scmp.ne.s32.totalorder %s83_s3, %s1686_s21  ;;  %p1690_p6 = scmp.lt.s32.totalorder %s1847_s14, %s1686_s21 }
  0x4c   :  { %p1691_p7 = por %p1690_p6, %p1689_p4 }
  0x4e   :  { %p1692_p8 = pnand %p1691_p7, %p1687_p3 }
  0x50   :  { %1695 = shalt.err (!%p1692_p8)  }
  0x51   :  { %s1696_s4 = scalar_lea.vmem %s1834_s25, 16  ;;  %p1701_p10 = scmp.lt.s32.totalorder %s1834_s25, %s1830_s22 }
  0x52   :  { %p1697_p9 = scmp.ne.s32.totalorder %s1834_s25, %s1696_s4  ;;  %p1702_p11 = scmp.lt.s32.totalorder %s1856_s18, %s1696_s4 }
  0x54   :  { %p1703_p12 = por %p1702_p11, %p1701_p10 }
  0x56   :  { %p1704_p13 = pnand %p1703_p12, %p1697_p9 }
  0x58   :  { %1707 = shalt.err (!%p1704_p13)  }
  0x59   :  { %96 = dma.hbm_to_vmem [thread:$0]  %s83_s3, 16, %s1834_s25, [#allocation3 + $0x1] }
  0x5a   :  { %s99_s29 = scalar_select %p98_p5, %s1832_s26, 0 }
  0x5b   :  { %p118_p0 = scmp.gt.s32.totalorder %s1836_s28, 0  ;;  %p1238_p1 = scmp.lt.s32.totalorder %s1836_s28, 63 }
  0x5c   :  { %s1963_s29 = smov (!%p1231_p2, %s99_s29), 63  ;;  %s1775_s0 = smov [#allocation2 + $0x3]  }
  0x5d   :  { %s119_s30 = scalar_select %p118_p0, %s1836_s28, 0 }
  0x5e   :  { %s1236_s9 = sshll.u32 %s1963_s29, 4  ;;  %s133_s13 = sshll.u32 %s1775_s0, 4  ;;  %s134_s13 = int_to_ptr.vmem [resolvable:$true] %s133_s13 }
  0x5f   :  { %s103_s12 = scalar_lea.hbm %s1946_s1, %s1236_s9 }
  0x60   :  { %s1708_s15 = scalar_lea.hbm %s103_s12, 16  ;;  %p1711_p4 = scmp.lt.s32.totalorder %s103_s12, %s1946_s1 }
  0x61   :  { %p1709_p3 = scmp.ne.s32.totalorder %s103_s12, %s1708_s15  ;;  %p1712_p6 = scmp.lt.s32.totalorder %s1847_s14, %s1708_s15 }
  0x63   :  { %p1713_p5 = por %p1712_p6, %p1711_p4 }
  0x65   :  { %p1714_p7 = pnand %p1713_p5, %p1709_p3 }
  0x67   :  { %1717 = shalt.err (!%p1714_p7)  }
  0x68   :  { %s1718_s25 = scalar_lea.vmem %s1838_s27, 16  ;;  %p1723_p8 = scmp.lt.s32.totalorder %s1838_s27, %s1830_s22 }
  0x69   :  { %p1719_p2 = scmp.ne.s32.totalorder %s1838_s27, %s1718_s25  ;;  %p1724_p9 = scmp.lt.s32.totalorder %s1856_s18, %s1718_s25 }
  0x6b   :  { %p1725_p10 = por %p1724_p9, %p1723_p8 }
  0x6d   :  { %p1726_p11 = pnand %p1725_p10, %p1719_p2 }
  0x6f   :  { %1729 = shalt.err (!%p1726_p11)  }
  0x70   :  { %116 = dma.hbm_to_vmem [thread:$0]  %s103_s12, 16, %s1838_s27, [#allocation3 + $0x2] }
  0x71   :  { %s1965_s30 = smov (!%p1238_p1, %s119_s30), 63 }
  0x72   :  { %s1243_s26 = sshll.u32 %s1965_s30, 4 }
  0x73   :  { %s123_s3 = scalar_lea.hbm %s1946_s1, %s1243_s26 }
  0x74   :  { %s1730_s21 = scalar_lea.hbm %s123_s3, 16  ;;  %p1733_p13 = scmp.lt.s32.totalorder %s123_s3, %s1946_s1 }
  0x75   :  { %p1731_p12 = scmp.ne.s32.totalorder %s123_s3, %s1730_s21  ;;  %p1734_p0 = scmp.lt.s32.totalorder %s1847_s14, %s1730_s21 }
  0x77   :  { %p1735_p3 = por %p1734_p0, %p1733_p13 }
  0x79   :  { %p1736_p4 = pnand %p1735_p3, %p1731_p12 }
  0x7b   :  { %1739 = shalt.err (!%p1736_p4)  }
  0x7c   :  { %s1740_s4 = scalar_lea.vmem %s134_s13, 16  ;;  %p1745_p6 = scmp.lt.s32.totalorder %s134_s13, %s1830_s22 }
  0x7d   :  { %p1741_p1 = scmp.ne.s32.totalorder %s134_s13, %s1740_s4  ;;  %p1746_p5 = scmp.lt.s32.totalorder %s1856_s18, %s1740_s4 }
  0x7f   :  { %p1747_p7 = por %p1746_p5, %p1745_p6 }
  0x81   :  { %p1748_p2 = pnand %p1747_p7, %p1741_p1 }
  0x83   :  { %1751 = shalt.err (!%p1748_p2)  }
  0x84   :  { %136 = dma.hbm_to_vmem [thread:$0]  %s123_s3, 16, %s134_s13, [#allocation3 + $0x3] }
  0x85   :  { %1758 = dma.done.wait [#allocation3], 16 }
  0x86   :  { %1759 = vsyncadd [#allocation3], 4294967280 }
  0x87   :  { %1760 = dma.done.wait [#allocation3 + $0x1], 16 }
  0x88   :  { %1761 = vsyncadd [#allocation3 + $0x1], 4294967280 }
  0x89   :  { %1762 = dma.done.wait [#allocation3 + $0x2], 16 }
  0x8a   :  { %1763 = vsyncadd [#allocation3 + $0x2], 4294967280 }
  0x8b   :  { %1764 = dma.done.wait [#allocation3 + $0x3], 16 }
  0x8c   :  { %1765 = vsyncadd [#allocation3 + $0x3], 4294967280  ;;  %v1400_v1 = vld [vmem:[#allocation6 + $0xe4] ss:$16 sps:$4 sm:$0xff]   ;;  %v1402_v2 = vld [vmem:[#allocation6 + $0xe0] ss:$16 sps:$4 sm:$0xff]  }
  0x8d   :  { %556 = vmatprep.subr.bf16.mxu0 %v1400_v1  ;;  %v1403_v3 = vld [vmem:[#allocation6 + $0xc4] ss:$16 sps:$4 sm:$0xff]   ;;  %v1405_v4 = vld [vmem:[#allocation6 + $0xc0] ss:$16 sps:$4 sm:$0xff]   ;;  %v1420_v8 = vld [vmem:[#allocation6 + $0xec] ss:$16 sps:$4 sm:$0xff]  }
  0x8e   :  { %557 = vmatpush1.bf16.msra.mxu0 %v1402_v2  ;;  %v1406_v5 = vld [vmem:[#allocation6 + $0xa4] ss:$16 sps:$4 sm:$0xff]   ;;  %v1408_v6 = vld [vmem:[#allocation6 + $0xa0] ss:$16 sps:$4 sm:$0xff]   ;;  %v1423_v9 = vld [vmem:[#allocation6 + $0xe8] ss:$16 sps:$4 sm:$0xff]   ;;  %597 = vmatprep.subr.bf16.mxu1 %v1420_v8 }
  0x8f   :  { %558 = vmatprep.subr.bf16.mxu0 %v1403_v3  ;;  %v1409_v7 = vld [vmem:[#allocation6 + $0x84] ss:$16 sps:$4 sm:$0xff]   ;;  %v1411_v10 = vld [vmem:[#allocation6 + $0x80] ss:$16 sps:$4 sm:$0xff]   ;;  %598 = vmatpush1.bf16.msra.mxu1 %v1423_v9  ;;  %v1426_v12 = vld [vmem:[#allocation6 + $0xcc] ss:$16 sps:$4 sm:$0xff]  }
  0x90   :  { %v1412_v11 = vld [vmem:[#allocation6 + $0x64] ss:$16 sps:$4 sm:$0xff]   ;;  %v1429_v13 = vld [vmem:[#allocation6 + $0xc8] ss:$16 sps:$4 sm:$0xff]   ;;  %599 = vmatprep.subr.bf16.mxu1 %v1426_v12  ;;  %v1414_v14 = vld [vmem:[#allocation6 + $0x60] ss:$16 sps:$4 sm:$0xff]  }
  0x91   :  { %v1415_v15 = vld [vmem:[#allocation6 + $0x44] ss:$16 sps:$4 sm:$0xff]   ;;  %v1432_v16 = vld [vmem:[#allocation6 + $0xac] ss:$16 sps:$4 sm:$0xff]   ;;  %v1435_v17 = vld [vmem:[#allocation6 + $0xa8] ss:$16 sps:$4 sm:$0xff]  }
  0x92   :  { %559 = vmatpush1.bf16.msra.mxu0 %v1405_v4  ;;  %v1438_v18 = vld [vmem:[#allocation6 + $0x8c] ss:$16 sps:$4 sm:$0xff]   ;;  %v1417_v19 = vld [vmem:[#allocation6 + $0x40] ss:$16 sps:$4 sm:$0xff]   ;;  %v1418_v20 = vld [vmem:[#allocation6 + $0x24] ss:$16 sps:$4 sm:$0xff]  }
  0x93   :  { %560 = vmatprep.subr.bf16.mxu0 %v1406_v5  ;;  %600 = vmatpush1.bf16.msra.mxu1 %v1429_v13  ;;  %v1441_v21 = vld [vmem:[#allocation6 + $0x88] ss:$16 sps:$4 sm:$0xff]   ;;  %v1444_v22 = vld [vmem:[#allocation6 + $0x6c] ss:$16 sps:$4 sm:$0xff]   ;;  %v1422_v23 = vld [vmem:[#allocation6 + $0x20] ss:$16 sps:$4 sm:$0xff]  }
  0x94   :  { %601 = vmatprep.subr.bf16.mxu1 %v1432_v16  ;;  %v1424_v24 = vld [vmem:[#allocation6 + $0x4] ss:$16 sps:$4 sm:$0xff]   ;;  %v1447_v25 = vld [vmem:[#allocation6 + $0x68] ss:$16 sps:$4 sm:$0xff]   ;;  %v1450_v26 = vld [vmem:[#allocation6 + $0x4c] ss:$16 sps:$4 sm:$0xff]  }
  0x95   :  { %v1428_v27 = vld [vmem:[#allocation6] ss:$16 sps:$4 sm:$0xff]   ;;  %v1430_v28 = vld [vmem:[#allocation6 + $0x1e4] ss:$16 sps:$4 sm:$0xff]   ;;  %v1453_v29 = vld [vmem:[#allocation6 + $0x48] ss:$16 sps:$4 sm:$0xff]  }
  0x96   :  { %561 = vmatpush1.bf16.msra.mxu0 %v1408_v6  ;;  %v1456_v30 = vld [vmem:[#allocation6 + $0x2c] ss:$16 sps:$4 sm:$0xff]   ;;  %v1434_v31 = vld [vmem:[#allocation6 + $0x1e0] ss:$16 sps:$4 sm:$0xff]   ;;  %v1436_v32 = vld [vmem:[#allocation6 + $0x1c4] ss:$16 sps:$4 sm:$0xff]  }
  0x97   :  { %562 = vmatprep.subr.bf16.mxu0 %v1409_v7  ;;  %602 = vmatpush1.bf16.msra.mxu1 %v1435_v17  ;;  %v1459_v33 = vld [vmem:[#allocation6 + $0x28] ss:$16 sps:$4 sm:$0xff]   ;;  %v1462_v34 = vld [vmem:[#allocation6 + $0xc] ss:$16 sps:$4 sm:$0xff]   ;;  %v1440_v36 = vld [vmem:[#allocation6 + $0x1c0] ss:$16 sps:$4 sm:$0xff]  }
  0x98   :  { %603 = vmatprep.subr.bf16.mxu1 %v1438_v18  ;;  %v1911_v35 = vld [vmem:[%s1947_s2] sm:$0xff]  ;;  %v1442_v38 = vld [vmem:[#allocation6 + $0x1a4] ss:$16 sps:$4 sm:$0xff]   ;;  %v1446_v41 = vld [vmem:[#allocation6 + $0x1a0] ss:$16 sps:$4 sm:$0xff]  }
  0x99   :  { %v149_v37 = vpack.c.bf16 %v1911_v35, %v1911_v35  ;;  %v1465_v39 = vld [vmem:[#allocation6 + $0x8] ss:$16 sps:$4 sm:$0xff]   ;;  %v1468_v40 = vld [vmem:[#allocation6 + $0x1ec] ss:$16 sps:$4 sm:$0xff]   ;;  %v1448_v42 = vld [vmem:[#allocation6 + $0x184] ss:$16 sps:$4 sm:$0xff]  }
  0x9a   :  { %563 = vmatpush1.bf16.msra.mxu0 %v1411_v10  ;;  %v1471_v43 = vld [vmem:[#allocation6 + $0x1e8] ss:$16 sps:$4 sm:$0xff]   ;;  %v1474_v44 = vld [vmem:[#allocation6 + $0x1cc] ss:$16 sps:$4 sm:$0xff]   ;;  %v1452_v45 = vld [vmem:[#allocation6 + $0x180] ss:$16 sps:$4 sm:$0xff]  }
  0x9b   :  { %564 = vmatprep.subr.bf16.mxu0 %v1412_v11  ;;  %604 = vmatpush1.bf16.msra.mxu1 %v1441_v21  ;;  %v1454_v46 = vld [vmem:[#allocation6 + $0x164] ss:$16 sps:$4 sm:$0xff]   ;;  %v1477_v47 = vld [vmem:[#allocation6 + $0x1c8] ss:$16 sps:$4 sm:$0xff]   ;;  %v1478_v48 = vld [vmem:[#allocation6 + $0x1ac] ss:$16 sps:$4 sm:$0xff]  }
  0x9c   :  { %605 = vmatprep.subr.bf16.mxu1 %v1444_v22  ;;  %588 = vmatprep.mubr.bf16.mxu0 %v149_v37  ;;  %v1458_v49 = vld [vmem:[#allocation6 + $0x160] ss:$16 sps:$4 sm:$0xff]   ;;  %v1460_v50 = vld [vmem:[#allocation6 + $0x144] ss:$16 sps:$4 sm:$0xff]   ;;  %v1480_v51 = vld [vmem:[#allocation6 + $0x1a8] ss:$16 sps:$4 sm:$0xff]  }
  0x9d   :  { %629 = vmatprep.mubr.bf16.mxu1 %v149_v37  ;;  %v1481_v52 = vld [vmem:[#allocation6 + $0x18c] ss:$16 sps:$4 sm:$0xff]   ;;  %v1464_v53 = vld [vmem:[#allocation6 + $0x140] ss:$16 sps:$4 sm:$0xff]   ;;  %v1466_v54 = vld [vmem:[#allocation6 + $0x124] ss:$16 sps:$4 sm:$0xff]  }
  0x9e   :  { %565 = vmatpush1.bf16.msra.mxu0 %v1414_v14  ;;  %v1483_v55 = vld [vmem:[#allocation6 + $0x188] ss:$16 sps:$4 sm:$0xff]   ;;  %v1484_v56 = vld [vmem:[#allocation6 + $0x16c] ss:$16 sps:$4 sm:$0xff]   ;;  %v1470_v57 = vld [vmem:[#allocation6 + $0x120] ss:$16 sps:$4 sm:$0xff]  }
  0x9f   :  { %566 = vmatprep.subr.bf16.mxu0 %v1415_v15  ;;  %606 = vmatpush1.bf16.msra.mxu1 %v1447_v25  ;;  %v1472_v58 = vld [vmem:[#allocation6 + $0x104] ss:$16 sps:$4 sm:$0xff]   ;;  %v1486_v59 = vld [vmem:[#allocation6 + $0x168] ss:$16 sps:$4 sm:$0xff]   ;;  %v1487_v60 = vld [vmem:[#allocation6 + $0x14c] ss:$16 sps:$4 sm:$0xff]  }
  0xa0   :  { %607 = vmatprep.subr.bf16.mxu1 %v1450_v26  ;;  %v1476_v61 = vld [vmem:[#allocation6 + $0x100] ss:$16 sps:$4 sm:$0xff]   ;;  %v146_v62 = vld [vmem:[#allocation2] sm:$0xff]  ;;  %v1498_v0 = vld [vmem:[#allocation8 + $0xe4] ss:$16 sps:$4 sm:$0xff]  }
  0xa1   :  { %v1489_v63 = vld [vmem:[#allocation6 + $0x148] ss:$16 sps:$4 sm:$0xff]   ;;  %v1490_v1 = vld [vmem:[#allocation6 + $0x12c] ss:$16 sps:$4 sm:$0xff]   ;;  %v1496_v2 = vld [vmem:[#allocation8 + $0xe0] ss:$16 sps:$4 sm:$0xff]   ;;  %v148_v3 = vpack.c.bf16 %v146_v62, %v146_v62 }
  0xa2   :  { %567 = vmatpush1.bf16.msra.mxu0 %v1417_v19  ;;  %v1492_v4 = vld [vmem:[#allocation6 + $0x128] ss:$16 sps:$4 sm:$0xff]   ;;  %v1504_v5 = vld [vmem:[#allocation8 + $0xc4] ss:$16 sps:$4 sm:$0xff]   ;;  %v1493_v6 = vld [vmem:[#allocation6 + $0x10c] ss:$16 sps:$4 sm:$0xff]  }
  0xa3   :  { %568 = vmatprep.subr.bf16.mxu0 %v1418_v20  ;;  %608 = vmatpush1.bf16.msra.mxu1 %v1453_v29  ;;  %v1502_v7 = vld [vmem:[#allocation8 + $0xc0] ss:$16 sps:$4 sm:$0xff]   ;;  %v1495_v8 = vld [vmem:[#allocation6 + $0x108] ss:$16 sps:$4 sm:$0xff]   ;;  %v1501_v9 = vld [vmem:[#allocation8 + $0xec] ss:$16 sps:$4 sm:$0xff]  }
  0xa4   :  { %609 = vmatprep.subr.bf16.mxu1 %v1456_v30  ;;  %v1499_v10 = vld [vmem:[#allocation8 + $0xe8] ss:$16 sps:$4 sm:$0xff]   ;;  %v1507_v11 = vld [vmem:[#allocation8 + $0xcc] ss:$16 sps:$4 sm:$0xff]   ;;  %v1510_v13 = vld [vmem:[#allocation8 + $0xa4] ss:$16 sps:$4 sm:$0xff]  }
  0xa5   :  { %v1505_v12 = vld [vmem:[#allocation8 + $0xc8] ss:$16 sps:$4 sm:$0xff]   ;;  %v1513_v14 = vld [vmem:[#allocation8 + $0xac] ss:$16 sps:$4 sm:$0xff]   ;;  %v1508_v15 = vld [vmem:[#allocation8 + $0xa0] ss:$16 sps:$4 sm:$0xff]  }
  0xa6   :  { %569 = vmatpush1.bf16.msra.mxu0 %v1422_v23  ;;  %v1511_v16 = vld [vmem:[#allocation8 + $0xa8] ss:$16 sps:$4 sm:$0xff]   ;;  %v1516_v17 = vld [vmem:[#allocation8 + $0x84] ss:$16 sps:$4 sm:$0xff]   ;;  %v1519_v18 = vld [vmem:[#allocation8 + $0x8c] ss:$16 sps:$4 sm:$0xff]  }
  0xa7   :  { %570 = vmatprep.subr.bf16.mxu0 %v1424_v24  ;;  %610 = vmatpush1.bf16.msra.mxu1 %v1459_v33  ;;  %v1514_v19 = vld [vmem:[#allocation8 + $0x80] ss:$16 sps:$4 sm:$0xff]   ;;  %v1517_v20 = vld [vmem:[#allocation8 + $0x88] ss:$16 sps:$4 sm:$0xff]   ;;  %v1522_v21 = vld [vmem:[#allocation8 + $0x64] ss:$16 sps:$4 sm:$0xff]  }
  0xa8   :  { %611 = vmatprep.subr.bf16.mxu1 %v1462_v34  ;;  %v1525_v22 = vld [vmem:[#allocation8 + $0x6c] ss:$16 sps:$4 sm:$0xff]   ;;  %v1520_v23 = vld [vmem:[#allocation8 + $0x60] ss:$16 sps:$4 sm:$0xff]   ;;  %v1523_v24 = vld [vmem:[#allocation8 + $0x68] ss:$16 sps:$4 sm:$0xff]  }
  0xa9   :  { %v1528_v25 = vld [vmem:[#allocation8 + $0x44] ss:$16 sps:$4 sm:$0xff]   ;;  %v1531_v26 = vld [vmem:[#allocation8 + $0x4c] ss:$16 sps:$4 sm:$0xff]   ;;  %v1541_v37 = vld [vmem:[#allocation8 + $0x8] ss:$16 sps:$4 sm:$0xff]  }
  0xaa   :  { %571 = vmatpush1.bf16.msra.mxu0 %v1428_v27  ;;  %v1526_v27 = vld [vmem:[#allocation8 + $0x40] ss:$16 sps:$4 sm:$0xff]   ;;  %v1534_v29 = vld [vmem:[#allocation8 + $0x24] ss:$16 sps:$4 sm:$0xff]   ;;  %v1537_v30 = vld [vmem:[#allocation8 + $0x2c] ss:$16 sps:$4 sm:$0xff]  }
  0xab   :  { %572 = vmatprep.subr.bf16.mxu0 %v1430_v28  ;;  %612 = vmatpush1.bf16.msra.mxu1 %v1465_v39  ;;  %v1529_v28 = vld [vmem:[#allocation8 + $0x48] ss:$16 sps:$4 sm:$0xff]   ;;  %v1540_v33 = vld [vmem:[#allocation8 + $0x4] ss:$16 sps:$4 sm:$0xff]   ;;  %v1543_v34 = vld [vmem:[#allocation8 + $0xc] ss:$16 sps:$4 sm:$0xff]  }
  0xac   :  { %613 = vmatprep.subr.bf16.mxu1 %v1468_v40  ;;  %v1549_v39 = vld [vmem:[#allocation8 + $0x1ec] ss:$16 sps:$4 sm:$0xff]   ;;  %v1544_v40 = vld [vmem:[#allocation8 + $0x1e0] ss:$16 sps:$4 sm:$0xff]  }
  0xad   :  { %v1918_v62 = vld [vmem:[%s1947_s2 + $0x8] sm:$0xff] }
  0xae   :  { %573 = vmatpush2.bf16.msra.mxu0 %v1434_v31  ;;  %v1532_v31 = vld [vmem:[#allocation8 + $0x20] ss:$16 sps:$4 sm:$0xff]  }
  0xaf   :  { %574 = vmatprep.subr.bf16.mxu0 %v1436_v32  ;;  %614 = vmatpush2.bf16.msra.mxu1 %v1471_v43  ;;  %v1535_v32 = vld [vmem:[#allocation8 + $0x28] ss:$16 sps:$4 sm:$0xff]   ;;  %v1555_v43 = vld [vmem:[#allocation8 + $0x1cc] ss:$16 sps:$4 sm:$0xff]  }
  0xb0   :  { %615 = vmatprep.subr.bf16.mxu1 %v1474_v44  ;;  %v1550_v44 = vld [vmem:[#allocation8 + $0x1c0] ss:$16 sps:$4 sm:$0xff]  }
  0xb2   :  { %575 = vmatpush2.bf16.msra.mxu0 %v1440_v36  ;;  %v1538_v36 = vld [vmem:[#allocation8] ss:$16 sps:$4 sm:$0xff]  }
  0xb3   :  { %576 = vmatprep.subr.bf16.mxu0 %v1442_v38  ;;  %616 = vmatpush2.bf16.msra.mxu1 %v1477_v47  ;;  %v1546_v38 = vld [vmem:[#allocation8 + $0x1e4] ss:$16 sps:$4 sm:$0xff]   ;;  %v1561_v47 = vld [vmem:[#allocation8 + $0x1ac] ss:$16 sps:$4 sm:$0xff]  }
  0xb4   :  { %617 = vmatprep.subr.bf16.mxu1 %v1478_v48  ;;  %v1556_v48 = vld [vmem:[#allocation8 + $0x1a0] ss:$16 sps:$4 sm:$0xff]  }
  0xb6   :  { %577 = vmatpush2.bf16.msra.mxu0 %v1446_v41  ;;  %v1547_v41 = vld [vmem:[#allocation8 + $0x1e8] ss:$16 sps:$4 sm:$0xff]  }
  0xb7   :  { %578 = vmatprep.subr.bf16.mxu0 %v1448_v42  ;;  %618 = vmatpush2.bf16.msra.mxu1 %v1480_v51  ;;  %v1552_v42 = vld [vmem:[#allocation8 + $0x1c4] ss:$16 sps:$4 sm:$0xff]   ;;  %v1567_v51 = vld [vmem:[#allocation8 + $0x18c] ss:$16 sps:$4 sm:$0xff]  }
  0xb8   :  { %619 = vmatprep.subr.bf16.mxu1 %v1481_v52  ;;  %v1562_v52 = vld [vmem:[#allocation8 + $0x180] ss:$16 sps:$4 sm:$0xff]  }
  0xba   :  { %579 = vmatpush2.bf16.msra.mxu0 %v1452_v45  ;;  %v1553_v45 = vld [vmem:[#allocation8 + $0x1c8] ss:$16 sps:$4 sm:$0xff]  }
  0xbb   :  { %580 = vmatprep.subr.bf16.mxu0 %v1454_v46  ;;  %620 = vmatpush2.bf16.msra.mxu1 %v1483_v55  ;;  %v1558_v46 = vld [vmem:[#allocation8 + $0x1a4] ss:$16 sps:$4 sm:$0xff]   ;;  %v1568_v55 = vld [vmem:[#allocation8 + $0x160] ss:$16 sps:$4 sm:$0xff]  }
  0xbc   :  { %621 = vmatprep.subr.bf16.mxu1 %v1484_v56  ;;  %v1571_v56 = vld [vmem:[#allocation8 + $0x168] ss:$16 sps:$4 sm:$0xff]  }
  0xbe   :  { %581 = vmatpush2.bf16.msra.mxu0 %v1458_v49  ;;  %v1559_v49 = vld [vmem:[#allocation8 + $0x1a8] ss:$16 sps:$4 sm:$0xff]  }
  0xbf   :  { %582 = vmatprep.subr.bf16.mxu0 %v1460_v50  ;;  %622 = vmatpush2.bf16.msra.mxu1 %v1486_v59  ;;  %v1564_v50 = vld [vmem:[#allocation8 + $0x184] ss:$16 sps:$4 sm:$0xff]   ;;  %v1579_v59 = vld [vmem:[#allocation8 + $0x14c] ss:$16 sps:$4 sm:$0xff]  }
  0xc0   :  { %623 = vmatprep.subr.bf16.mxu1 %v1487_v60  ;;  %v1574_v60 = vld [vmem:[#allocation8 + $0x140] ss:$16 sps:$4 sm:$0xff]  }
  0xc2   :  { %583 = vmatpush2.bf16.msra.mxu0 %v1464_v53  ;;  %v1565_v53 = vld [vmem:[#allocation8 + $0x188] ss:$16 sps:$4 sm:$0xff]  }
  0xc3   :  { %584 = vmatprep.subr.bf16.mxu0 %v1466_v54  ;;  %624 = vmatpush2.bf16.msra.mxu1 %v1489_v63  ;;  %v1570_v54 = vld [vmem:[#allocation8 + $0x164] ss:$16 sps:$4 sm:$0xff]  }
  0xc4   :  { %625 = vmatprep.subr.bf16.mxu1 %v1490_v1  ;;  %v1582_v63 = vld [vmem:[#allocation8 + $0x124] ss:$16 sps:$4 sm:$0xff]   ;;  %v661_v1 = vpack.c.bf16 %v1918_v62, %v1918_v62 }
  0xc6   :  { %585 = vmatpush2.bf16.msra.mxu0 %v1470_v57  ;;  %v1573_v57 = vld [vmem:[#allocation8 + $0x16c] ss:$16 sps:$4 sm:$0xff]  }
  0xc7   :  { %586 = vmatprep.subr.bf16.mxu0 %v1472_v58  ;;  %626 = vmatpush2.bf16.msra.mxu1 %v1492_v4  ;;  %v1576_v58 = vld [vmem:[#allocation8 + $0x144] ss:$16 sps:$4 sm:$0xff]  }
  0xc8   :  { %627 = vmatprep.subr.bf16.mxu1 %v1493_v6  ;;  %v1588_v4 = vld [vmem:[#allocation8 + $0x104] ss:$16 sps:$4 sm:$0xff]   ;;  %v1586_v6 = vld [vmem:[#allocation8 + $0x100] ss:$16 sps:$4 sm:$0xff]  }
  0xca   :  { %587 = vmatpush2.bf16.msra.mxu0 %v1476_v61  ;;  %v1577_v61 = vld [vmem:[#allocation8 + $0x148] ss:$16 sps:$4 sm:$0xff]  }
  0xcb   :  { %1068 = vmatprep.subr.bf16.mxu0 %v1498_v0  ;;  %628 = vmatpush2.bf16.msra.mxu1 %v1495_v8  ;;  %v1585_v0 = vld [vmem:[#allocation8 + $0x12c] ss:$16 sps:$4 sm:$0xff]   ;;  %v216_v8 = vlaneseq }
  0xcc   :  { %1109 = vmatprep.subr.bf16.mxu1 %v1501_v9 }
  0xcd   :  { %589 = vmatmul.mubr.bf16.vlgmr.msra.gmra.mxu0 %v148_v3  ;;  %v1922_v9 = vshrl.u32 %v216_v8, 7 }
  0xce   :  { %1069 = vmatpush1.bf16.msra.mxu0 %v1496_v2  ;;  %630 = vmatmul.mubr.bf16.vlgmr.msra.gmra.mxu1 %v148_v3  ;;  %v1580_v2 = vld [vmem:[#allocation8 + $0x120] ss:$16 sps:$4 sm:$0xff]   ;;  %v1583_v3 = vld [vmem:[#allocation8 + $0x128] ss:$16 sps:$4 sm:$0xff]  }
  0xcf   :  { %1070 = vmatprep.subr.bf16.mxu0 %v1504_v5  ;;  %1110 = vmatpush1.bf16.msra.mxu1 %v1499_v10  ;;  %v1591_v5 = vld [vmem:[#allocation8 + $0x10c] ss:$16 sps:$4 sm:$0xff]   ;;  %v218_v10 = vsub.s32 0, %v1922_v9 }
  0xd0   :  { %1111 = vmatprep.subr.bf16.mxu1 %v1507_v11  ;;  %1100 = vmatprep.mubr.bf16.mxu0 %v661_v1  ;;  %v214_v11 = vld [vmem:[%s1950_s5] sm:$0xf] }
  0xd1   :  { %1141 = vmatprep.mubr.bf16.mxu1 %v661_v1 }
  0xd2   :  { %1071 = vmatpush1.bf16.msra.mxu0 %v1502_v7  ;;  %v1589_v7 = vld [vmem:[#allocation8 + $0x108] ss:$16 sps:$4 sm:$0xff]  }
  0xd3   :  { %1112 = vmatpush1.bf16.msra.mxu1 %v1505_v12  ;;  %1072 = vmatprep.subr.bf16.mxu0 %v1510_v13  ;;  %v219_v12 = vrot.slane %v214_v11, %v218_v10  ;;  %v222_v13 = vsub.s32 1, %v1922_v9 }
  0xd4   :  { %1113 = vmatprep.subr.bf16.mxu1 %v1513_v14 }
  0xd6   :  { %1073 = vmatpush1.bf16.msra.mxu0 %v1508_v15 }
  0xd7   :  { %1114 = vmatpush1.bf16.msra.mxu1 %v1511_v16  ;;  %1074 = vmatprep.subr.bf16.mxu0 %v1516_v17 }
  0xd8   :  { %1115 = vmatprep.subr.bf16.mxu1 %v1519_v18  ;;  %v223_v18 = vrot.slane %v214_v11, %v222_v13 }
  0xda   :  { %1075 = vmatpush1.bf16.msra.mxu0 %v1514_v19 }
  0xdb   :  { %1116 = vmatpush1.bf16.msra.mxu1 %v1517_v20  ;;  %1076 = vmatprep.subr.bf16.mxu0 %v1522_v21 }
  0xdc   :  { %1117 = vmatprep.subr.bf16.mxu1 %v1525_v22 }
  0xde   :  { %1077 = vmatpush1.bf16.msra.mxu0 %v1520_v23 }
  0xdf   :  { %1118 = vmatpush1.bf16.msra.mxu1 %v1523_v24  ;;  %1078 = vmatprep.subr.bf16.mxu0 %v1528_v25 }
  0xe0   :  { %1119 = vmatprep.subr.bf16.mxu1 %v1531_v26 }
  0xe2   :  { %1079 = vmatpush1.bf16.msra.mxu0 %v1526_v27 }
  0xe3   :  { %1120 = vmatpush1.bf16.msra.mxu1 %v1529_v28  ;;  %1080 = vmatprep.subr.bf16.mxu0 %v1534_v29  ;;  %v230_v29 = vsub.s32 3, %v1922_v9 }
  0xe4   :  { %1121 = vmatprep.subr.bf16.mxu1 %v1537_v30  ;;  %v226_v30 = vsub.s32 2, %v1922_v9 }
  0xe6   :  { %1081 = vmatpush1.bf16.msra.mxu0 %v1532_v31 }
  0xe7   :  { %1122 = vmatpush1.bf16.msra.mxu1 %v1535_v32  ;;  %1082 = vmatprep.subr.bf16.mxu0 %v1540_v33  ;;  %v231_v32 = vrot.slane %v214_v11, %v230_v29 }
  0xe8   :  { %1123 = vmatprep.subr.bf16.mxu1 %v1543_v34  ;;  %v227_v34 = vrot.slane %v214_v11, %v226_v30 }
  0xea   :  { %1083 = vmatpush1.bf16.msra.mxu0 %v1538_v36 }
  0xeb   :  { %1124 = vmatpush1.bf16.msra.mxu1 %v1541_v37  ;;  %1084 = vmatprep.subr.bf16.mxu0 %v1546_v38 }
  0xec   :  { %1125 = vmatprep.subr.bf16.mxu1 %v1549_v39 }
  0xee   :  { %1085 = vmatpush2.bf16.msra.mxu0 %v1544_v40 }
  0xef   :  { %1126 = vmatpush2.bf16.msra.mxu1 %v1547_v41  ;;  %1086 = vmatprep.subr.bf16.mxu0 %v1552_v42 }
  0xf0   :  { %1127 = vmatprep.subr.bf16.mxu1 %v1555_v43 }
  0xf2   :  { %1087 = vmatpush2.bf16.msra.mxu0 %v1550_v44 }
  0xf3   :  { %1128 = vmatpush2.bf16.msra.mxu1 %v1553_v45  ;;  %1088 = vmatprep.subr.bf16.mxu0 %v1558_v46 }
  0xf4   :  { %1129 = vmatprep.subr.bf16.mxu1 %v1561_v47 }
  0xf6   :  { %1089 = vmatpush2.bf16.msra.mxu0 %v1556_v48  ;;  %v726_v48 = vld [vmem:[%s1951_s6] sm:$0xf] }
  0xf7   :  { %1130 = vmatpush2.bf16.msra.mxu1 %v1559_v49  ;;  %1090 = vmatprep.subr.bf16.mxu0 %v1564_v50  ;;  %v731_v49 = vrot.slane %v726_v48, %v218_v10 }
  0xf8   :  { %1131 = vmatprep.subr.bf16.mxu1 %v1567_v51 }
  0xfa   :  { %1091 = vmatpush2.bf16.msra.mxu0 %v1562_v52 }
  0xfb   :  { %1132 = vmatpush2.bf16.msra.mxu1 %v1565_v53  ;;  %1092 = vmatprep.subr.bf16.mxu0 %v1570_v54 }
  0xfc   :  { %1133 = vmatprep.subr.bf16.mxu1 %v1573_v57 }
  0xfe   :  { %1093 = vmatpush2.bf16.msra.mxu0 %v1568_v55 }
  0xff   :  { %1134 = vmatpush2.bf16.msra.mxu1 %v1571_v56  ;;  %1094 = vmatprep.subr.bf16.mxu0 %v1576_v58 }
 0x100   :  { %1135 = vmatprep.subr.bf16.mxu1 %v1579_v59 }
 0x102   :  { %1095 = vmatpush2.bf16.msra.mxu0 %v1574_v60 }
 0x103   :  { %1136 = vmatpush2.bf16.msra.mxu1 %v1577_v61  ;;  %1096 = vmatprep.subr.bf16.mxu0 %v1582_v63 }
 0x104   :  { %1137 = vmatprep.subr.bf16.mxu1 %v1585_v0 }
 0x106   :  { %1097 = vmatpush2.bf16.msra.mxu0 %v1580_v2  ;;  %v743_v2 = vrot.slane %v726_v48, %v230_v29 }
 0x107   :  { %1138 = vmatpush2.bf16.msra.mxu1 %v1583_v3  ;;  %1098 = vmatprep.subr.bf16.mxu0 %v1588_v4  ;;  %v739_v3 = vrot.slane %v726_v48, %v226_v30 }
 0x108   :  { %1139 = vmatprep.subr.bf16.mxu1 %v1591_v5 }
 0x10a   :  { %1099 = vmatpush2.bf16.msra.mxu0 %v1586_v6 }
 0x10b   :  { %1140 = vmatpush2.bf16.msra.mxu1 %v1589_v7 }
 0x18d   :  { %v590_v14 = vpop.f32.mrf.mxu0 }
 0x18e   :  { %v591_v15 = vadd.f32 %v590_v14, %v219_v12  ;;  %v631_v22 = vpop.f32.mrf.mxu1 }
 0x18f   :  { %v592_v16 = vpop.f32.mrf.mxu0  ;;  %v632_v38 = vadd.f32 %v631_v22, %v227_v34 }
 0x190   :  { %v1308_v17 = vmul.f32 -1.442695, %v591_v15  ;;  %v593_v21 = vadd.f32 %v592_v16, %v223_v18  ;;  %v633_v24 = vpop.f32.mrf.mxu1 }
 0x191   :  { %v594_v19 = vpop.f32.mrf.mxu0  ;;  %v634_v36 = vadd.f32 %v633_v24, %v231_v32 }
 0x192   :  { %1592 = vpow2.f32 %v1308_v17  ;;  %v1309_v23 = vmul.f32 -1.442695, %v593_v21  ;;  %v635_v25 = vpop.f32.mrf.mxu1 }
 0x193   :  { %v595_v20 = vpop.f32.mrf.mxu0 }
 0x194   :  { %1594 = vpow2.f32 %v1309_v23  ;;  %v636_v26 = vpop.f32.mrf.mxu1 }
 0x19f   :  { %v1593_v27 = vpop.eup %1592 }
 0x1a0   :  { %v641_v28 = vadd.f32 1.0, %v1593_v27 }
 0x1a1   :  { %v1595_v31 = vpop.eup %1594 }
 0x1a2   :  { %1596 = vrcp.f32 %v641_v28  ;;  %v647_v33 = vadd.f32 1.0, %v1595_v31 }
 0x1a4   :  { %1598 = vrcp.f32 %v647_v33 }
 0x1af   :  { %v1597_v37 = vpop.eup %1596 }
 0x1b0   :  { %v650_v39 = vmul.f32 %v1597_v37, %v634_v36 }
 0x1b1   :  { %v1599_v41 = vpop.eup %1598 }
 0x1b2   :  { %v651_v40 = vadd.f32 %v650_v39, %v632_v38  ;;  %v653_v42 = vsub.f32 1.0, %v1599_v41  ;;  %v655_v45 = vmul.f32 %v1599_v41, %v1911_v35  ;;  %v735_v35 = vrot.slane %v726_v48, %v222_v13 }
 0x1b4   :  { %1600 = vtanh.f32 %v651_v40 }
 0x1c1   :  { %v1601_v43 = vpop.eup %1600 }
 0x1c2   :  { %v654_v44 = vmul.f32 %v1601_v43, %v653_v42 }
 0x1c4   :  { %v656_v46 = vadd.f32 %v655_v45, %v654_v44 }
 0x1c6   :  { %657 = vst [vmem:[%s1952_s7] sm:$0xff] %v656_v46  ;;  %v660_v47 = vpack.c.bf16 %v656_v46, %v656_v46 }
 0x1c8   :  { %1101 = vmatmul.mubr.bf16.vlgmr.msra.gmra.mxu0 %v660_v47  ;;  %1142 = vmatmul.mubr.bf16.vlgmr.msra.gmra.mxu1 %v660_v47 }
 0x288   :  { %v1102_v50 = vpop.f32.mrf.mxu0  ;;  %v1143_v51 = vpop.f32.mrf.mxu1 }
 0x289   :  { %v1103_v52 = vadd.f32 %v1102_v50, %v731_v49  ;;  %v1144_v7 = vadd.f32 %v1143_v51, %v739_v3 }
 0x28a   :  { %v1104_v53 = vpop.f32.mrf.mxu0  ;;  %v1145_v54 = vpop.f32.mrf.mxu1 }
 0x28b   :  { %v1375_v55 = vmul.f32 -1.442695, %v1103_v52  ;;  %v1105_v60 = vadd.f32 %v1104_v53, %v735_v35  ;;  %v1146_v5 = vadd.f32 %v1145_v54, %v743_v2 }
 0x28c   :  { %v1106_v56 = vpop.f32.mrf.mxu0  ;;  %v1147_v57 = vpop.f32.mrf.mxu1 }
 0x28d   :  { %1602 = vpow2.f32 %v1375_v55  ;;  %v1376_v61 = vmul.f32 -1.442695, %v1105_v60 }
 0x28e   :  { %v1107_v58 = vpop.f32.mrf.mxu0  ;;  %v1148_v59 = vpop.f32.mrf.mxu1 }
 0x28f   :  { %1604 = vpow2.f32 %v1376_v61 }
 0x29a   :  { %v1603_v63 = vpop.eup %1602 }
 0x29b   :  { %v1153_v0 = vadd.f32 1.0, %v1603_v63 }
 0x29c   :  { %v1605_v1 = vpop.eup %1604 }
 0x29d   :  { %1606 = vrcp.f32 %v1153_v0  ;;  %v1159_v4 = vadd.f32 1.0, %v1605_v1 }
 0x29f   :  { %1608 = vrcp.f32 %v1159_v4 }
 0x2aa   :  { %v1607_v6 = vpop.eup %1606 }
 0x2ab   :  { %v1162_v8 = vmul.f32 %v1607_v6, %v1146_v5 }
 0x2ac   :  { %v1609_v10 = vpop.eup %1608 }
 0x2ad   :  { %v1163_v9 = vadd.f32 %v1162_v8, %v1144_v7  ;;  %v1165_v11 = vsub.f32 1.0, %v1609_v10  ;;  %v1167_v13 = vmul.f32 %v1609_v10, %v1918_v62 }
 0x2af   :  { %1610 = vtanh.f32 %v1163_v9 }
 0x2bc   :  { %v1611_v12 = vpop.eup %1610 }
 0x2bd   :  { %v1166_v14 = vmul.f32 %v1611_v12, %v1165_v11 }
 0x2bf   :  { %v1168_v15 = vadd.f32 %v1167_v13, %v1166_v14 }
 0x2c1   :  { %1377 = vst [vmem:[%s1952_s7 + $0x8] sm:$0xff] %v1168_v15  ;;  %1171 = vst [vmem:[%s1953_s8] sm:$0xff] %v1168_v15 }
 0x2c2   :  { %1180 = vsyncpa [#allocation7], 1 }
 0x2c3   :  { %1181 = vsyncpa [#allocation9], 1 }
 0x2c4   :  { %1182 = vsyncmov [#allocation3] }
 0x2c7   :  { %s1183_s12 = vpop.sfrf %1182 }
 0x2c8   :  { %p1378_p8 = scmp.ne.s32.totalorder %s1183_s12, 0 }
 0x2ca   :  { %1187 = shalt.err (%p1378_p8)  }
 0x2cb   :  { %1189 = vsyncmov [#allocation3 + $0x1] }
 0x2ce   :  { %s1190_s0 = vpop.sfrf %1189 }
 0x2cf   :  { %p1379_p9 = scmp.ne.s32.totalorder %s1190_s0, 0 }
 0x2d1   :  { %1194 = shalt.err (%p1379_p9)  }
 0x2d2   :  { %1196 = vsyncmov [#allocation3 + $0x2] }
 0x2d5   :  { %s1197_s13 = vpop.sfrf %1196 }
 0x2d6   :  { %p1380_p10 = scmp.ne.s32.totalorder %s1197_s13, 0 }
 0x2d8   :  { %1201 = shalt.err (%p1380_p10)  }
 0x2d9   :  { %1203 = vsyncmov [#allocation3 + $0x3] }
 0x2dc   :  { %s1204_s7 = vpop.sfrf %1203 }
 0x2dd   :  { %p1381_p11 = scmp.ne.s32.totalorder %s1204_s7, 0 }
 0x2df   :  { %1208 = shalt.err (%p1381_p11)  }

</bundles_post_ra>
